<compile_context>
chip_gen: v6e
topology: v6e:2x2x1
jax: 0.10.0
libtpu: 0.0.40
codegen_flags: <defaults>
</compile_context>

<pallas_src>
import jax
import jax.numpy as jnp
from jax.experimental import pallas as pl
from jax.experimental.pallas import tpu as pltpu

NEG_SLOPE = 0.2  # PyG GATConv default negative_slope


# ---------------------------------------------------------------------------
# Pallas kernel: 3 GAT layers + node-mean pooling, S packed super-graphs/step
# ---------------------------------------------------------------------------
def gnn_kernel(x_ref, mask_ref, w13_ref, w2_ref, w3b_ref,
               b1_ref, b2_ref, b3_ref, pool_ref, out_ref):
    S, GN, C = x_ref.shape
    Hp = w13_ref.shape[1] // 2          # padded augmented width per layer
    H = b1_ref.shape[1]                 # true hidden width
    OW = out_ref.shape[2]               # lane-padded pooled output width

    x = x_ref[...]                      # [S, GN, C]   bf16
    # Precomputed additive block-diagonal mask (0 on edges, -1e30 elsewhere).
    mask = mask_ref[...].astype(jnp.float32)             # [S, GN, GN] f32

    def project(v, w_ref):
        # Shared weights: flatten super-graphs so the MXU sees S*GN rows.
        k = v.shape[-1]
        h = jnp.dot(v.reshape(S * GN, k), w_ref[...],
                    preferred_element_type=jnp.float32)
        return h.reshape(S, GN, w_ref.shape[1])

    def attend(h_aug, b_ref):
        # h_aug cols: [0:H] = W x, [H] = a_src.(W x), [H+1] = a_dst.(W x)
        h = h_aug[..., :H]
        al_src = h_aug[..., H:H + 1]
        al_dst = h_aug[..., H + 1:H + 2]
        e = al_dst + jnp.transpose(al_src, (0, 2, 1))     # e[s, i, j]
        e = jnp.where(e > 0, e, NEG_SLOPE * e) + mask     # LeakyReLU + mask
        e = e - jnp.max(e, axis=-1, keepdims=True)
        p = jnp.exp(e)                                    # masked entries -> 0
        inv = pl.reciprocal(jnp.sum(p, axis=-1, keepdims=True), approx=True)
        alpha = (p * inv).astype(jnp.bfloat16)
        agg = jnp.einsum('sij,sjh->sih', alpha, h.astype(jnp.bfloat16),
                         preferred_element_type=jnp.float32)
        return agg + b_ref[...]                           # [S, GN, H]  f32

    # gat1 + the x-part of gat3 fused into one projection (shared M, K=C).
    h13 = project(x, w13_ref)                             # [S, GN, 2*Hp]
    x1 = attend(h13[..., :Hp], b1_ref)
    x2 = attend(project(x1.astype(jnp.bfloat16), w2_ref), b2_ref)
    # gat3 on concat([x, x2], -1) == x @ W3a + x2 @ W3b  (split-weight form)
    h3 = h13[..., Hp:] + project(x2.astype(jnp.bfloat16), w3b_ref)
    x3 = attend(h3, b3_ref)

    # Single merged pooled-mean output, lane-padded to OW (>=128 lanes).
    parts = [x1, x2, x3]
    if OW > 3 * H:
        parts.append(jnp.zeros((S, GN, OW - 3 * H), jnp.float32))
    xcat = jnp.concatenate(parts, axis=-1)                # [S, GN, OW] f32
    pool = jnp.broadcast_to(pool_ref[...][None], (S,) + pool_ref.shape)
    out_ref[...] = jnp.einsum('sgk,skh->sgh', pool, xcat,
                              preferred_element_type=jnp.float32)


# ---------------------------------------------------------------------------
# Wrapper: super-graph packing, weight prep, FC head in plain XLA
# ---------------------------------------------------------------------------
def gnn_forward(x, adj, P, sg_per_step=8):
    B, N, C = x.shape
    H = P["w1"].shape[1]
    wdt = jnp.bfloat16

    # --- packing geometry ---------------------------------------------------
    G = max(1, 128 // N)                 # graphs per block-diag super-graph
    GN = G * N
    SG = -(-B // G)                      # super-graphs needed
    S = max(1, min(sg_per_step, SG))     # super-graphs per grid step
    if SG >= 2:                          # keep >=2 grid steps (v7x: 2 TCs)
        S = min(S, -(-SG // 2))
    n_blocks = -(-SG // S)
    SGpad = n_blocks * S
    Bpad = SGpad * G

    # --- pad batch with self-loop-only graphs (keeps every softmax row valid)
    adj_f = adj.astype(jnp.float32)
    x_f = x
    if Bpad != B:
        pad = Bpad - B
        x_f = jnp.concatenate([x_f, jnp.zeros((pad, N, C), x.dtype)], axis=0)
        eye = jnp.broadcast_to(jnp.eye(N, dtype=jnp.float32), (pad, N, N))
        adj_f = jnp.concatenate([adj_f, eye], axis=0)

    # --- block-diagonal additive mask (bf16) + packed node features ---------
    adj_sg = adj_f.reshape(SGpad, G, N, N)
    eye_g = jnp.eye(G, dtype=jnp.float32)
    super_adj = jnp.einsum('gq,bgij->bgiqj', eye_g, adj_sg).reshape(SGpad, GN, GN)
    mask = jnp.where(super_adj > 0, 0.0, -1e30).astype(wdt)   # bf16 holds -1e30
    x_k = x_f.reshape(SGpad, GN, C).astype(wdt)

    # --- weights: fold attention vectors into projections, pad to Hp lanes --
    Hp = 64 if H + 2 <= 64 else -(-(H + 2) // 128) * 128

    def aug_pad(w, a_src, a_dst):
        cols = jnp.concatenate(
            [w, w @ a_src.reshape(H, 1), w @ a_dst.reshape(H, 1)], axis=1)
        pad = Hp - cols.shape[1]
        if pad > 0:
            cols = jnp.concatenate(
                [cols, jnp.zeros((w.shape[0], pad), w.dtype)], axis=1)
        return cols

    w3a, w3b = P["w3"][:C], P["w3"][C:]
    w13 = jnp.concatenate([aug_pad(P["w1"], P["as1"], P["ad1"]),
                           aug_pad(w3a, P["as3"], P["ad3"])], axis=1).astype(wdt)
    w2p = aug_pad(P["w2"], P["as2"], P["ad2"]).astype(wdt)
    w3bp = aug_pad(w3b, P["as3"], P["ad3"]).astype(wdt)
    b1 = P["b1"].reshape(1, H)
    b2 = P["b2"].reshape(1, H)
    b3 = P["b3"].reshape(1, H)

    # Per-graph mean pooling matrix over packed super-graph rows: [G, GN].
    pool = (jnp.kron(jnp.eye(G, dtype=jnp.float32),
                     jnp.ones((1, N), jnp.float32)) / N)

    OW = -(-(3 * H) // 128) * 128        # lane-dense merged output width

    consts = [w13, w2p, w3bp, b1, b2, b3, pool]
    in_specs = [
        pl.BlockSpec((S, GN, C), lambda b: (b, 0, 0)),
        pl.BlockSpec((S, GN, GN), lambda b: (b, 0, 0)),
    ] + [pl.BlockSpec(c.shape, lambda b, nd=c.ndim: (0,) * nd) for c in consts]

    # NOTE: at production shapes re-derive S against per-generation VMEM
    # (mask/e/p are [S, GN, GN] live; roughly halve S on v7x's 64 MiB and raise
    # vmem_limit_bytes on v5e/v6e before growing S). 32 MiB is ample here.
    out = pl.pallas_call(
        gnn_kernel,
        grid=(n_blocks,),
        in_specs=in_specs,
        out_specs=pl.BlockSpec((S, G, OW), lambda b: (b, 0, 0)),
        out_shape=jax.ShapeDtypeStruct((SGpad, G, OW), jnp.float32),
        compiler_params=pltpu.CompilerParams(
            dimension_semantics=("parallel",),
            vmem_limit_bytes=32 * 1024 * 1024),
    )(x_k, mask, *consts)

    pooled = out.reshape(Bpad, OW)[:B, :3 * H]            # drop pad graphs/lanes
    m0 = jnp.mean(x, axis=1)                              # exact f32 mean of raw x
    feats = jnp.concatenate(
        [m0, pooled[:, :H], pooled[:, H:2 * H], pooled[:, 2 * H:]], axis=-1)

    # FC head as ordinary batched XLA matmuls over the whole batch (f32).
    hfc = jnp.maximum(feats @ P["wf1"] + P["bf1"], 0.0)
    return hfc @ P["wf2"] + P["bf2"]                      # [B, num_classes]


# ---------------------------------------------------------------------------
# Pure-JAX f32 reference (module semantics: real concats, unsplit weights)
# ---------------------------------------------------------------------------
def _gat_ref(x, adj, w, a_src, a_dst, b):
    h = x @ w
    asrc = jnp.sum(h * a_src, axis=-1, keepdims=True)
    adst = jnp.sum(h * a_dst, axis=-1, keepdims=True)
    e = adst + asrc.T
    e = jnp.where(e > 0, e, NEG_SLOPE * e)
    e = jnp.where(adj > 0, e, -1e30)
    e = e - jnp.max(e, axis=-1, keepdims=True)
    p = jnp.exp(e) * adj
    alpha = p / jnp.sum(p, axis=-1, keepdims=True)
    return alpha @ h + b


def model_ref(x, adj, P):
    def single(xg, ag):
        x1 = _gat_ref(xg, ag, P["w1"], P["as1"], P["ad1"], P["b1"])
        x2 = _gat_ref(x1, ag, P["w2"], P["as2"], P["ad2"], P["b2"])
        xc = jnp.concatenate([xg, x2], axis=-1)
        x3 = _gat_ref(xc, ag, P["w3"], P["as3"], P["ad3"], P["b3"])
        x4 = jnp.concatenate([xg, x1, x2, x3], axis=-1)
        return jnp.mean(x4, axis=0)

    feats = jax.vmap(single)(x, adj)
    hfc = jnp.maximum(feats @ P["wf1"] + P["bf1"], 0.0)
    return hfc @ P["wf2"] + P["bf2"]


# ---------------------------------------------------------------------------
# Parameter / input construction
# ---------------------------------------------------------------------------
def make_params(key, in_channels, hidden_dim, num_classes, fc_hidden=512):
    C, H = in_channels, hidden_dim
    s = 0.1
    keys = jax.random.split(key, 16)

    def rnd(i, shape):
        return s * jax.random.normal(keys[i], shape, jnp.float32)

    return dict(
        w1=rnd(0, (C, H)), as1=rnd(1, (1, H)), ad1=rnd(2, (1, H)), b1=rnd(3, (H,)),
        w2=rnd(4, (H, H)), as2=rnd(5, (1, H)), ad2=rnd(6, (1, H)), b2=rnd(7, (H,)),
        w3=rnd(8, (C + H, H)), as3=rnd(9, (1, H)), ad3=rnd(10, (1, H)), b3=rnd(11, (H,)),
        wf1=rnd(12, (C + 3 * H, fc_hidden)), bf1=rnd(13, (fc_hidden,)),
        wf2=rnd(14, (fc_hidden, num_classes)), bf2=rnd(15, (num_classes,)),
    )


def edges_to_dense_adj(edge_index, num_nodes):
    """edge_index: [B, 2, E] int32 (row 0 = src, row 1 = dst) -> [B, N, N] mask."""
    B = edge_index.shape[0]
    src, dst = edge_index[:, 0, :], edge_index[:, 1, :]
    adj = jnp.zeros((B, num_nodes, num_nodes), jnp.float32)
    batch_idx = jnp.arange(B)[:, None]
    adj = adj.at[batch_idx, dst, src].set(1.0)                       # adj[i=dst, j=src]
    # Self loops keep every softmax row non-empty (required by the kernel).
    adj = jnp.maximum(adj, jnp.eye(num_nodes, dtype=jnp.float32)[None])
    return adj


if __name__ == "__main__":
    B, N, E = 2, 16, 40          # graphs, nodes per graph, edges per graph
    C, H, NC = 4, 32, 10         # in_channels, hidden_dim, num_classes

    key = jax.random.PRNGKey(0)
    k_x, k_src, k_dst, k_p = jax.random.split(key, 4)

    batch_node = jax.random.normal(k_x, (B, N, C), jnp.float32)
    src = jax.random.randint(k_src, (B, E), 0, N, jnp.int32)
    dst = jax.random.randint(k_dst, (B, E), 0, N, jnp.int32)
    batch_edge = jnp.stack([src, dst], axis=1)                 # [B, 2, E]

    adj = edges_to_dense_adj(batch_edge, N)                    # [B, N, N]
    params = make_params(k_p, C, H, NC)

    logits = jax.block_until_ready(gnn_forward(batch_node, adj, params))
    ref = jax.block_until_ready(model_ref(batch_node, adj, params))

    assert logits.shape == (B, NC), logits.shape
    assert bool(jnp.all(jnp.isfinite(logits)))
    # bf16 MXU operands + approx reciprocal vs. f32 reference -> relaxed tol.
    assert jnp.allclose(logits, ref, atol=2e-2, rtol=2e-2), (logits, ref)
    print("KERNEL_OK")
</pallas_src>

<mosaic_0001>
module attributes {stable_mosaic.version = 11 : i64} {
  func.func @gnn_kernel(%arg0: i32, %arg1: memref<1x128x4xbf16, #tpu.memory_space<vmem>>, %arg2: memref<1x128x128xbf16, #tpu.memory_space<vmem>>, %arg3: memref<4x128xbf16, #tpu.memory_space<vmem>>, %arg4: memref<32x64xbf16, #tpu.memory_space<vmem>>, %arg5: memref<32x64xbf16, #tpu.memory_space<vmem>>, %arg6: memref<1x32xf32, #tpu.memory_space<vmem>>, %arg7: memref<1x32xf32, #tpu.memory_space<vmem>>, %arg8: memref<1x32xf32, #tpu.memory_space<vmem>>, %arg9: memref<8x128xf32, #tpu.memory_space<vmem>>, %arg10: memref<1x8x128xf32, #tpu.memory_space<vmem>>) attributes {dimension_semantics = [#tpu.dimension_semantics<parallel>], iteration_bounds = array<i64: 1>, scalar_prefetch = 0 : i64, scratch_operands = 0 : i64, tpu.core_type = #tpu.core_type<tc>, window_params = [{transform_indices = @transform_0, window_bounds = array<i64: 1, 128, 4>}, {transform_indices = @transform_1, window_bounds = array<i64: 1, 128, 128>}, {pipeline_mode = #tpu.pipeline_mode<synchronous>, transform_indices = @transform_2, window_bounds = array<i64: 4, 128>}, {pipeline_mode = #tpu.pipeline_mode<synchronous>, transform_indices = @transform_3, window_bounds = array<i64: 32, 64>}, {pipeline_mode = #tpu.pipeline_mode<synchronous>, transform_indices = @transform_4, window_bounds = array<i64: 32, 64>}, {pipeline_mode = #tpu.pipeline_mode<synchronous>, transform_indices = @transform_5, window_bounds = array<i64: 1, 32>}, {pipeline_mode = #tpu.pipeline_mode<synchronous>, transform_indices = @transform_6, window_bounds = array<i64: 1, 32>}, {pipeline_mode = #tpu.pipeline_mode<synchronous>, transform_indices = @transform_7, window_bounds = array<i64: 1, 32>}, {pipeline_mode = #tpu.pipeline_mode<synchronous>, transform_indices = @transform_8, window_bounds = array<i64: 8, 128>}, {transform_indices = @transform_9, window_bounds = array<i64: 1, 8, 128>}]} {
    %c0 = arith.constant 0 : index
    %c0_0 = arith.constant 0 : index
    %c0_1 = arith.constant 0 : index
    %0 = vector.load %arg1[%c0, %c0_0, %c0_1] : memref<1x128x4xbf16, #tpu.memory_space<vmem>>, vector<1x128x4xbf16>
    %c0_2 = arith.constant 0 : index
    %c0_3 = arith.constant 0 : index
    %c0_4 = arith.constant 0 : index
    %1 = vector.load %arg2[%c0_2, %c0_3, %c0_4] : memref<1x128x128xbf16, #tpu.memory_space<vmem>>, vector<1x128x128xbf16>
    %2 = arith.extf %1 : vector<1x128x128xbf16> to vector<1x128x128xf32>
    %3 = vector.shape_cast %0 : vector<1x128x4xbf16> to vector<128x4xbf16>
    %c0_5 = arith.constant 0 : index
    %c0_6 = arith.constant 0 : index
    %4 = vector.load %arg3[%c0_5, %c0_6] : memref<4x128xbf16, #tpu.memory_space<vmem>>, vector<4x128xbf16>
    %cst = arith.constant dense<0.000000e+00> : vector<128x128xf32>
    %5 = tpu.matmul %3, %4, %cst {dimension_numbers = #tpu.dot_dimension_numbers<[1], [0], [0], [1], [0, 0, 1, 1], [], []>} : vector<128x4xbf16>, vector<4x128xbf16>, vector<128x128xf32> -> vector<128x128xf32>
    %6 = vector.shape_cast %5 : vector<128x128xf32> to vector<1x128x128xf32>
    %7 = vector.extract_strided_slice %6 {offsets = [0, 0, 0], sizes = [1, 128, 64], strides = [1, 1, 1]} : vector<1x128x128xf32> to vector<1x128x64xf32>
    %8 = vector.extract_strided_slice %7 {offsets = [0, 0, 0], sizes = [1, 128, 32], strides = [1, 1, 1]} : vector<1x128x64xf32> to vector<1x128x32xf32>
    %9 = vector.extract_strided_slice %7 {offsets = [0, 0, 32], sizes = [1, 128, 1], strides = [1, 1, 1]} : vector<1x128x64xf32> to vector<1x128x1xf32>
    %10 = vector.extract_strided_slice %7 {offsets = [0, 0, 33], sizes = [1, 128, 1], strides = [1, 1, 1]} : vector<1x128x64xf32> to vector<1x128x1xf32>
    %11 = tpu.transpose %9, [0, 2, 1] : vector<1x128x1xf32> -> vector<1x1x128xf32>
    %12 = vector.broadcast %10 : vector<1x128x1xf32> to vector<1x128x128xf32>
    %13 = vector.broadcast %11 : vector<1x1x128xf32> to vector<1x128x128xf32>
    %14 = arith.addf %12, %13 : vector<1x128x128xf32>
    %cst_7 = arith.constant 0.000000e+00 : f32
    %15 = vector.broadcast %cst_7 : f32 to vector<1x128x128xf32>
    %16 = arith.cmpf ogt, %14, %15 : vector<1x128x128xf32>
    %cst_8 = arith.constant 2.000000e-01 : f32
    %17 = vector.broadcast %cst_8 : f32 to vector<1x128x128xf32>
    %18 = arith.mulf %17, %14 : vector<1x128x128xf32>
    %19 = arith.select %16, %14, %18 : vector<1x128x128xi1>, vector<1x128x128xf32>
    %20 = arith.addf %19, %2 : vector<1x128x128xf32>
    %cst_9 = arith.constant dense<0xFF800000> : vector<1x128xf32>
    %21 = vector.multi_reduction <maximumf>, %20, %cst_9 [2] : vector<1x128x128xf32> to vector<1x128xf32>
    %22 = vector.shape_cast %21 : vector<1x128xf32> to vector<1x128x1xf32>
    %23 = vector.broadcast %22 : vector<1x128x1xf32> to vector<1x128x128xf32>
    %24 = arith.subf %20, %23 : vector<1x128x128xf32>
    %25 = math.exp %24 : vector<1x128x128xf32>
    %cst_10 = arith.constant dense<0.000000e+00> : vector<1x128xf32>
    %26 = vector.multi_reduction <add>, %25, %cst_10 [2] : vector<1x128x128xf32> to vector<1x128xf32>
    %27 = vector.shape_cast %26 : vector<1x128xf32> to vector<1x128x1xf32>
    %28 = tpu.reciprocal %27 {approx = true} : vector<1x128x1xf32> -> vector<1x128x1xf32>
    %29 = vector.broadcast %28 : vector<1x128x1xf32> to vector<1x128x128xf32>
    %30 = arith.mulf %25, %29 : vector<1x128x128xf32>
    %31 = arith.truncf %30 : vector<1x128x128xf32> to vector<1x128x128xbf16>
    %32 = arith.truncf %8 : vector<1x128x32xf32> to vector<1x128x32xbf16>
    "tpu.trace_start"() <{level = 10 : i32, message = "sij,sjh->sih"}> : () -> ()
    %cst_11 = arith.constant dense<0.000000e+00> : vector<1x128x32xf32>
    %33 = tpu.matmul %31, %32, %cst_11 {dimension_numbers = #tpu.dot_dimension_numbers<[2], [1], [1], [2], [0, 0, 0, 1, 1, 2], [0], [0]>} : vector<1x128x128xbf16>, vector<1x128x32xbf16>, vector<1x128x32xf32> -> vector<1x128x32xf32>
    "tpu.trace_stop"() : () -> ()
    %c0_12 = arith.constant 0 : index
    %c0_13 = arith.constant 0 : index
    %34 = vector.load %arg6[%c0_12, %c0_13] : memref<1x32xf32, #tpu.memory_space<vmem>>, vector<1x32xf32>
    %35 = vector.shape_cast %34 : vector<1x32xf32> to vector<1x1x32xf32>
    %36 = vector.broadcast %35 : vector<1x1x32xf32> to vector<1x128x32xf32>
    %37 = arith.addf %33, %36 : vector<1x128x32xf32>
    %38 = arith.truncf %37 : vector<1x128x32xf32> to vector<1x128x32xbf16>
    %39 = vector.shape_cast %38 : vector<1x128x32xbf16> to vector<128x32xbf16>
    %c0_14 = arith.constant 0 : index
    %c0_15 = arith.constant 0 : index
    %40 = vector.load %arg4[%c0_14, %c0_15] : memref<32x64xbf16, #tpu.memory_space<vmem>>, vector<32x64xbf16>
    %cst_16 = arith.constant dense<0.000000e+00> : vector<128x64xf32>
    %41 = tpu.matmul %39, %40, %cst_16 {dimension_numbers = #tpu.dot_dimension_numbers<[1], [0], [0], [1], [0, 0, 1, 1], [], []>} : vector<128x32xbf16>, vector<32x64xbf16>, vector<128x64xf32> -> vector<128x64xf32>
    %42 = vector.shape_cast %41 : vector<128x64xf32> to vector<1x128x64xf32>
    %43 = vector.extract_strided_slice %42 {offsets = [0, 0, 0], sizes = [1, 128, 32], strides = [1, 1, 1]} : vector<1x128x64xf32> to vector<1x128x32xf32>
    %44 = vector.extract_strided_slice %42 {offsets = [0, 0, 32], sizes = [1, 128, 1], strides = [1, 1, 1]} : vector<1x128x64xf32> to vector<1x128x1xf32>
    %45 = vector.extract_strided_slice %42 {offsets = [0, 0, 33], sizes = [1, 128, 1], strides = [1, 1, 1]} : vector<1x128x64xf32> to vector<1x128x1xf32>
    %46 = tpu.transpose %44, [0, 2, 1] : vector<1x128x1xf32> -> vector<1x1x128xf32>
    %47 = vector.broadcast %45 : vector<1x128x1xf32> to vector<1x128x128xf32>
    %48 = vector.broadcast %46 : vector<1x1x128xf32> to vector<1x128x128xf32>
    %49 = arith.addf %47, %48 : vector<1x128x128xf32>
    %cst_17 = arith.constant 0.000000e+00 : f32
    %50 = vector.broadcast %cst_17 : f32 to vector<1x128x128xf32>
    %51 = arith.cmpf ogt, %49, %50 : vector<1x128x128xf32>
    %cst_18 = arith.constant 2.000000e-01 : f32
    %52 = vector.broadcast %cst_18 : f32 to vector<1x128x128xf32>
    %53 = arith.mulf %52, %49 : vector<1x128x128xf32>
    %54 = arith.select %51, %49, %53 : vector<1x128x128xi1>, vector<1x128x128xf32>
    %55 = arith.addf %54, %2 : vector<1x128x128xf32>
    %cst_19 = arith.constant dense<0xFF800000> : vector<1x128xf32>
    %56 = vector.multi_reduction <maximumf>, %55, %cst_19 [2] : vector<1x128x128xf32> to vector<1x128xf32>
    %57 = vector.shape_cast %56 : vector<1x128xf32> to vector<1x128x1xf32>
    %58 = vector.broadcast %57 : vector<1x128x1xf32> to vector<1x128x128xf32>
    %59 = arith.subf %55, %58 : vector<1x128x128xf32>
    %60 = math.exp %59 : vector<1x128x128xf32>
    %cst_20 = arith.constant dense<0.000000e+00> : vector<1x128xf32>
    %61 = vector.multi_reduction <add>, %60, %cst_20 [2] : vector<1x128x128xf32> to vector<1x128xf32>
    %62 = vector.shape_cast %61 : vector<1x128xf32> to vector<1x128x1xf32>
    %63 = tpu.reciprocal %62 {approx = true} : vector<1x128x1xf32> -> vector<1x128x1xf32>
    %64 = vector.broadcast %63 : vector<1x128x1xf32> to vector<1x128x128xf32>
    %65 = arith.mulf %60, %64 : vector<1x128x128xf32>
    %66 = arith.truncf %65 : vector<1x128x128xf32> to vector<1x128x128xbf16>
    %67 = arith.truncf %43 : vector<1x128x32xf32> to vector<1x128x32xbf16>
    "tpu.trace_start"() <{level = 10 : i32, message = "sij,sjh->sih"}> : () -> ()
    %cst_21 = arith.constant dense<0.000000e+00> : vector<1x128x32xf32>
    %68 = tpu.matmul %66, %67, %cst_21 {dimension_numbers = #tpu.dot_dimension_numbers<[2], [1], [1], [2], [0, 0, 0, 1, 1, 2], [0], [0]>} : vector<1x128x128xbf16>, vector<1x128x32xbf16>, vector<1x128x32xf32> -> vector<1x128x32xf32>
    "tpu.trace_stop"() : () -> ()
    %c0_22 = arith.constant 0 : index
    %c0_23 = arith.constant 0 : index
    %69 = vector.load %arg7[%c0_22, %c0_23] : memref<1x32xf32, #tpu.memory_space<vmem>>, vector<1x32xf32>
    %70 = vector.shape_cast %69 : vector<1x32xf32> to vector<1x1x32xf32>
    %71 = vector.broadcast %70 : vector<1x1x32xf32> to vector<1x128x32xf32>
    %72 = arith.addf %68, %71 : vector<1x128x32xf32>
    %73 = vector.extract_strided_slice %6 {offsets = [0, 0, 64], sizes = [1, 128, 64], strides = [1, 1, 1]} : vector<1x128x128xf32> to vector<1x128x64xf32>
    %74 = arith.truncf %72 : vector<1x128x32xf32> to vector<1x128x32xbf16>
    %75 = vector.shape_cast %74 : vector<1x128x32xbf16> to vector<128x32xbf16>
    %c0_24 = arith.constant 0 : index
    %c0_25 = arith.constant 0 : index
    %76 = vector.load %arg5[%c0_24, %c0_25] : memref<32x64xbf16, #tpu.memory_space<vmem>>, vector<32x64xbf16>
    %cst_26 = arith.constant dense<0.000000e+00> : vector<128x64xf32>
    %77 = tpu.matmul %75, %76, %cst_26 {dimension_numbers = #tpu.dot_dimension_numbers<[1], [0], [0], [1], [0, 0, 1, 1], [], []>} : vector<128x32xbf16>, vector<32x64xbf16>, vector<128x64xf32> -> vector<128x64xf32>
    %78 = vector.shape_cast %77 : vector<128x64xf32> to vector<1x128x64xf32>
    %79 = arith.addf %73, %78 : vector<1x128x64xf32>
    %80 = vector.extract_strided_slice %79 {offsets = [0, 0, 0], sizes = [1, 128, 32], strides = [1, 1, 1]} : vector<1x128x64xf32> to vector<1x128x32xf32>
    %81 = vector.extract_strided_slice %79 {offsets = [0, 0, 32], sizes = [1, 128, 1], strides = [1, 1, 1]} : vector<1x128x64xf32> to vector<1x128x1xf32>
    %82 = vector.extract_strided_slice %79 {offsets = [0, 0, 33], sizes = [1, 128, 1], strides = [1, 1, 1]} : vector<1x128x64xf32> to vector<1x128x1xf32>
    %83 = tpu.transpose %81, [0, 2, 1] : vector<1x128x1xf32> -> vector<1x1x128xf32>
    %84 = vector.broadcast %82 : vector<1x128x1xf32> to vector<1x128x128xf32>
    %85 = vector.broadcast %83 : vector<1x1x128xf32> to vector<1x128x128xf32>
    %86 = arith.addf %84, %85 : vector<1x128x128xf32>
    %cst_27 = arith.constant 0.000000e+00 : f32
    %87 = vector.broadcast %cst_27 : f32 to vector<1x128x128xf32>
    %88 = arith.cmpf ogt, %86, %87 : vector<1x128x128xf32>
    %cst_28 = arith.constant 2.000000e-01 : f32
    %89 = vector.broadcast %cst_28 : f32 to vector<1x128x128xf32>
    %90 = arith.mulf %89, %86 : vector<1x128x128xf32>
    %91 = arith.select %88, %86, %90 : vector<1x128x128xi1>, vector<1x128x128xf32>
    %92 = arith.addf %91, %2 : vector<1x128x128xf32>
    %cst_29 = arith.constant dense<0xFF800000> : vector<1x128xf32>
    %93 = vector.multi_reduction <maximumf>, %92, %cst_29 [2] : vector<1x128x128xf32> to vector<1x128xf32>
    %94 = vector.shape_cast %93 : vector<1x128xf32> to vector<1x128x1xf32>
    %95 = vector.broadcast %94 : vector<1x128x1xf32> to vector<1x128x128xf32>
    %96 = arith.subf %92, %95 : vector<1x128x128xf32>
    %97 = math.exp %96 : vector<1x128x128xf32>
    %cst_30 = arith.constant dense<0.000000e+00> : vector<1x128xf32>
    %98 = vector.multi_reduction <add>, %97, %cst_30 [2] : vector<1x128x128xf32> to vector<1x128xf32>
    %99 = vector.shape_cast %98 : vector<1x128xf32> to vector<1x128x1xf32>
    %100 = tpu.reciprocal %99 {approx = true} : vector<1x128x1xf32> -> vector<1x128x1xf32>
    %101 = vector.broadcast %100 : vector<1x128x1xf32> to vector<1x128x128xf32>
    %102 = arith.mulf %97, %101 : vector<1x128x128xf32>
    %103 = arith.truncf %102 : vector<1x128x128xf32> to vector<1x128x128xbf16>
    %104 = arith.truncf %80 : vector<1x128x32xf32> to vector<1x128x32xbf16>
    "tpu.trace_start"() <{level = 10 : i32, message = "sij,sjh->sih"}> : () -> ()
    %cst_31 = arith.constant dense<0.000000e+00> : vector<1x128x32xf32>
    %105 = tpu.matmul %103, %104, %cst_31 {dimension_numbers = #tpu.dot_dimension_numbers<[2], [1], [1], [2], [0, 0, 0, 1, 1, 2], [0], [0]>} : vector<1x128x128xbf16>, vector<1x128x32xbf16>, vector<1x128x32xf32> -> vector<1x128x32xf32>
    "tpu.trace_stop"() : () -> ()
    %c0_32 = arith.constant 0 : index
    %c0_33 = arith.constant 0 : index
    %106 = vector.load %arg8[%c0_32, %c0_33] : memref<1x32xf32, #tpu.memory_space<vmem>>, vector<1x32xf32>
    %107 = vector.shape_cast %106 : vector<1x32xf32> to vector<1x1x32xf32>
    %108 = vector.broadcast %107 : vector<1x1x32xf32> to vector<1x128x32xf32>
    %109 = arith.addf %105, %108 : vector<1x128x32xf32>
    %cst_34 = arith.constant 0.000000e+00 : f32
    %110 = vector.broadcast %cst_34 : f32 to vector<1x128x32xf32>
    %111 = tpu.concatenate %37, %72, %109, %110 in 2 : vector<1x128x32xf32>, vector<1x128x32xf32>, vector<1x128x32xf32>, vector<1x128x32xf32> -> vector<1x128x128xf32>
    %c0_35 = arith.constant 0 : index
    %c0_36 = arith.constant 0 : index
    %112 = vector.load %arg9[%c0_35, %c0_36] : memref<8x128xf32, #tpu.memory_space<vmem>>, vector<8x128xf32>
    %113 = vector.shape_cast %112 : vector<8x128xf32> to vector<1x8x128xf32>
    "tpu.trace_start"() <{level = 10 : i32, message = "sgk,skh->sgh"}> : () -> ()
    %cst_37 = arith.constant dense<0.000000e+00> : vector<1x8x128xf32>
    %114 = tpu.matmul %113, %111, %cst_37 {dimension_numbers = #tpu.dot_dimension_numbers<[2], [1], [1], [2], [0, 0, 0, 1, 1, 2], [0], [0]>} : vector<1x8x128xf32>, vector<1x128x128xf32>, vector<1x8x128xf32> -> vector<1x8x128xf32>
    "tpu.trace_stop"() : () -> ()
    %c0_38 = arith.constant 0 : index
    %c0_39 = arith.constant 0 : index
    %c0_40 = arith.constant 0 : index
    %115 = vector.load %arg10[%c0_38, %c0_39, %c0_40] : memref<1x8x128xf32, #tpu.memory_space<vmem>>, vector<1x8x128xf32>
    tpu.vector_store %arg10[%c0_38, %c0_39, %c0_40], %114 {strides = array<i32>} : memref<1x8x128xf32, #tpu.memory_space<vmem>>, vector<1x8x128xf32>,
    return
  }
  func.func @transform_0(%arg0: i32) -> (i32, i32, i32) {
    %c0_i32 = arith.constant 0 : i32
    %c0_i32_0 = arith.constant 0 : i32
    %c0_i32_1 = arith.constant 0 : i32
    return %arg0, %c0_i32, %c0_i32_0 : i32, i32, i32
  }
  func.func @transform_1(%arg0: i32) -> (i32, i32, i32) {
    %c0_i32 = arith.constant 0 : i32
    %c0_i32_0 = arith.constant 0 : i32
    %c0_i32_1 = arith.constant 0 : i32
    return %arg0, %c0_i32, %c0_i32_0 : i32, i32, i32
  }
  func.func @transform_2(%arg0: i32) -> (i32, i32) {
    %c0_i32 = arith.constant 0 : i32
    %c0_i32_0 = arith.constant 0 : i32
    %c0_i32_1 = arith.constant 0 : i32
    return %c0_i32, %c0_i32_0 : i32, i32
  }
  func.func @transform_3(%arg0: i32) -> (i32, i32) {
    %c0_i32 = arith.constant 0 : i32
    %c0_i32_0 = arith.constant 0 : i32
    %c0_i32_1 = arith.constant 0 : i32
    return %c0_i32, %c0_i32_0 : i32, i32
  }
  func.func @transform_4(%arg0: i32) -> (i32, i32) {
    %c0_i32 = arith.constant 0 : i32
    %c0_i32_0 = arith.constant 0 : i32
    %c0_i32_1 = arith.constant 0 : i32
    return %c0_i32, %c0_i32_0 : i32, i32
  }
  func.func @transform_5(%arg0: i32) -> (i32, i32) {
    %c0_i32 = arith.constant 0 : i32
    %c0_i32_0 = arith.constant 0 : i32
    %c0_i32_1 = arith.constant 0 : i32
    return %c0_i32, %c0_i32_0 : i32, i32
  }
  func.func @transform_6(%arg0: i32) -> (i32, i32) {
    %c0_i32 = arith.constant 0 : i32
    %c0_i32_0 = arith.constant 0 : i32
    %c0_i32_1 = arith.constant 0 : i32
    return %c0_i32, %c0_i32_0 : i32, i32
  }
  func.func @transform_7(%arg0: i32) -> (i32, i32) {
    %c0_i32 = arith.constant 0 : i32
    %c0_i32_0 = arith.constant 0 : i32
    %c0_i32_1 = arith.constant 0 : i32
    return %c0_i32, %c0_i32_0 : i32, i32
  }
  func.func @transform_8(%arg0: i32) -> (i32, i32) {
    %c0_i32 = arith.constant 0 : i32
    %c0_i32_0 = arith.constant 0 : i32
    %c0_i32_1 = arith.constant 0 : i32
    return %c0_i32, %c0_i32_0 : i32, i32
  }
  func.func @transform_9(%arg0: i32) -> (i32, i32, i32) {
    %c0_i32 = arith.constant 0 : i32
    %c0_i32_0 = arith.constant 0 : i32
    %c0_i32_1 = arith.constant 0 : i32
    return %arg0, %c0_i32, %c0_i32_0 : i32, i32, i32
  }
}

</mosaic_0001>

<bundles_post_ra>
// kernel: tpu_custom_call.1
= control target key start
LH: loop header
LB: loop body
LE: loop exit
PB: predicated region body
PF: predicated region fallthrough
CT: control target
= control target key end

     0   :  { %14 = vsyncpa [#allocation3], 0  ;;  %s4359_s0 = inlined_call_operand.vmem [shape: bf16[1,128,4], index: 0, kind: input, shape index: {}]   ;;  %s4360_s1 = inlined_call_operand.vmem [shape: bf16[1,128,128], index: 1, kind: input, shape index: {}]   ;;  %s4361_s2 = inlined_call_operand.hbm [shape: bf16[4,128], index: 2, kind: input, shape index: {}]   ;;  %s4362_s3 = inlined_call_operand.hbm [shape: bf16[32,64], index: 3, kind: input, shape index: {}]   ;;  %s4363_s4 = inlined_call_operand.hbm [shape: bf16[32,64], index: 4, kind: input, shape index: {}]   ;;  %s4364_s5 = inlined_call_operand.vmem [shape: f32[1,32], index: 5, kind: input, shape index: {}]   ;;  %s4365_s6 = inlined_call_operand.vmem [shape: f32[1,32], index: 6, kind: input, shape index: {}]   ;;  %s4366_s7 = inlined_call_operand.vmem [shape: f32[1,32], index: 7, kind: input, shape index: {}]   ;;  %s4367_s8 = inlined_call_operand.vmem [shape: f32[8,128], index: 8, kind: input, shape index: {}]   ;;  %s4368_s9 = inlined_call_operand.hbm [shape: f32[1,8,128], index: 9, kind: output, shape index: {}]  }
   0x1   :  { %15 = vsyncpa [#allocation6], 0 }
   0x2   :  { %16 = vsyncpa [#allocation4], 0  ;;  %s3165_s30 = smov [#allocation5]  }
   0x3   :  { %s36_s10 = sshll.u32 %s3165_s30, 4  ;;  %s37_s10 = int_to_ptr.vmem [resolvable:$true] %s36_s10 }
   0x4   :  { %s3087_s11 = scalar_lea.vmem %s37_s10, 256  ;;  %p3092_p1 = scmp.lt.s32.totalorder %s37_s10, %s37_s10 }
   0x5   :  { %p3088_p0 = scmp.ne.s32.totalorder %s37_s10, %s3087_s11  ;;  %p3093_p2 = scmp.lt.s32.totalorder %s3087_s11, %s3087_s11 }
   0x7   :  { %p3094_p3 = por %p3093_p2, %p3092_p1 }
   0x9   :  { %p3095_p4 = pnand %p3094_p3, %p3088_p0 }
   0xb   :  { %3098 = shalt.err (!%p3095_p4)
}
   0xc   :  { %s3166_s12 = smov 64   ;;  %s3167_s13 = smov 4  }
   0xd   :  { %42 = dma.hbm_to_vmem [thread:$0]  %s4362_s3, 256, %s37_s10, [#allocation6], %s3166_s12, %s3166_s12, %s3167_s13  }
   0xe   :  { %s3168_s16 = smov [#allocation2]   ;;  %s3169_s18 = smov [#allocation7]  }
   0xf   :  { %s27_s17 = sshll.u32 %s3168_s16, 4  ;;  %s48_s19 = sshll.u32 %s3169_s18, 4  ;;  %s28_s17 = int_to_ptr.vmem [resolvable:$true] %s27_s17  ;;  %s49_s19 = int_to_ptr.vmem [resolvable:$true] %s48_s19 }
  0x10   :  { %s3107_s20 = scalar_lea.vmem %s28_s17, 32  ;;  %p3112_p6 = scmp.lt.s32.totalorder %s28_s17, %s28_s17 }
  0x11   :  { %p3108_p5 = scmp.ne.s32.totalorder %s28_s17, %s3107_s20  ;;  %p3113_p7 = scmp.lt.s32.totalorder %s3107_s20, %s3107_s20 }
  0x13   :  { %p3114_p8 = por %p3113_p7, %p3112_p6 }
  0x15   :  { %p3115_p9 = pnand %p3114_p8, %p3108_p5 }
  0x17   :  { %3118 = shalt.err (!%p3115_p9)
}
  0x18   :  { %30 = dma.hbm_to_vmem [thread:$0]  %s4361_s2, 32, %s28_s17, [#allocation3]  }
  0x19   :  { %s3127_s23 = scalar_lea.vmem %s49_s19, 256  ;;  %p3132_p11 = scmp.lt.s32.totalorder %s49_s19, %s49_s19 }
  0x1a   :  { %p3128_p10 = scmp.ne.s32.totalorder %s49_s19, %s3127_s23  ;;  %p3133_p12 = scmp.lt.s32.totalorder %s3127_s23, %s3127_s23 }
  0x1c   :  { %p3134_p13 = por %p3133_p12, %p3132_p11 }
  0x1e   :  { %p3135_p0 = pnand %p3134_p13, %p3128_p10 }
  0x20   :  { %3138 = shalt.err (!%p3135_p0)
}
  0x21   :  { %54 = dma.hbm_to_vmem [thread:$0]  %s4363_s4, 256, %s49_s19, [#allocation6], %s3166_s12, %s3166_s12, %s3167_s13  }
  0x22   :  { %3159 = dma.done.wait [#allocation3], 32  }
  0x23   :  { %3160 = vsyncadd [#allocation3], 4294967264 }
  0x24   :  { %3161 = dma.done.wait [#allocation6], 512  }
  0x25   :  { %3162 = vsyncadd [#allocation6], 4294966784  ;;  %vm187_vm0 = vcmask 1041408   ;;  %vm162_vm1 = vcmask 31744   ;;  %v121_v0 = vld [vmem:[#allocation2] sm:$0x3]  ;;  %v448_v59 = vlaneseq }
  0x26   :  { %2858 = vmatprep.subr.msk.bf16.mxu0 %vm187_vm0, %v121_v0  ;;  %v189_v1 = vsel %vm187_vm0, %v121_v0, 0  ;;  %v2875_v2 = vld [vmem:[%s4359_s0] sm:$0xff]   ;;  %v2876_v3 = vld [vmem:[%s4359_s0 + $0x8] sm:$0xff]   ;;  %v2877_v4 = vld [vmem:[%s4359_s0 + $0x10] sm:$0xff]   ;;  %v3170_v10 = vmov 33   ;;  %s3171_s19 = smov 96  }
  0x27   :  { %2670 = vmatpush3.bf16.msra.mxu0 %v189_v1  ;;  %2671 = vmatprep.mubr.msk.bf16.mxu0 %vm162_vm1, %v2875_v2  ;;  %v2878_v5 = vld [vmem:[%s4359_s0 + $0x18] sm:$0xff]   ;;  %v2879_v6 = vld [vmem:[%s4359_s0 + $0x20] sm:$0xff]   ;;  %v2880_v7 = vld [vmem:[%s4359_s0 + $0x28] sm:$0xff]   ;;  %v449_v60 = vshrl.u32 %v448_v59, 7  ;;  %s3176_s16 = smov [#allocation8]  }
  0x28   :  { %v2881_v8 = vld [vmem:[%s4359_s0 + $0x30] sm:$0xff]   ;;  %v2882_v9 = vld [vmem:[%s4359_s0 + $0x38] sm:$0xff]   ;;  %2872 = vset.pattern.permute.xlu1 %v3170_v10  ;;  %2871 = vset.pattern.permute.xlu0 %v3170_v10  ;;  %v2537_v0 = vld [vmem:[%s4360_s1] sm:$0xff]   ;;  %s2471_s17 = sshll.u32 %s3176_s16, 4  ;;  %s2472_s17 = int_to_ptr.vmem [resolvable:$true] %s2471_s17 }
  0x29   :  { %v3376_v61 = vsub.s32 0, %v449_v60  ;;  %s3139_s18 = scalar_lea.vmem %s2472_s17, 128  ;;  %p3144_p2 = scmp.lt.s32.totalorder %s2472_s17, %s2472_s17 }
  0x2a   :  { %2672 = vmatmul.mubr.msk.bf16.vlgmr.msra.gmra.mxu0 %vm162_vm1, %v2876_v3  ;;  %p3140_p1 = scmp.ne.s32.totalorder %s2472_s17, %s3139_s18  ;;  %p3145_p3 = scmp.lt.s32.totalorder %s3139_s18, %s3139_s18 }
  0x2b   :  { %2675 = vmatprep.mubr.msk.bf16.mxu0 %vm162_vm1, %v2877_v4  ;;  %v3386_v4 = vunpack.c.l.bf16 %v2537_v0 }
  0x2c   :  { %p3146_p4 = por %p3145_p3, %p3144_p2 }
  0x2e   :  { %p3147_p5 = pnand %p3146_p4, %p3140_p1 }
  0x32   :  { %2676 = vmatmul.mubr.msk.bf16.gmra.mxu0 %vm162_vm1, %v2878_v5 }
  0x33   :  { %2679 = vmatprep.mubr.msk.bf16.mxu0 %vm162_vm1, %v2879_v6 }
  0x3a   :  { %2680 = vmatmul.mubr.msk.bf16.gmra.mxu0 %vm162_vm1, %v2880_v7 }
  0x3b   :  { %2683 = vmatprep.mubr.msk.bf16.mxu0 %vm162_vm1, %v2881_v8 }
  0x42   :  { %2684 = vmatmul.mubr.msk.bf16.gmra.mxu0 %vm162_vm1, %v2882_v9 }
  0xea   :  { %v3272_v11 = vpop.f32.mrf.mxu0 }
  0xeb   :  { %308 = vrot.lane.b32.xlu1 %v3272_v11, %s3171_s19 }
  0xec   :  { %v3276_v12 = vpop.f32.mrf.mxu0 }
  0xed   :  { %304 = vrot.lane.b32.xlu0 %v3276_v12, %s3171_s19 }
  0xee   :  { %v3280_v13 = vpop.f32.mrf.mxu0 }
  0xef   :  { %310 = vrot.lane.b32.xlu1 %v3280_v13, %s3171_s19  ;;  %v685_v33 = vpack.c.bf16 %v3280_v13, %v3272_v11 }
  0xf0   :  { %v3284_v14 = vpop.f32.mrf.mxu0 }
  0xf1   :  { %306 = vrot.lane.b32.xlu0 %v3284_v14, %s3171_s19  ;;  %v684_v34 = vpack.c.bf16 %v3284_v14, %v3276_v12 }
  0xf2   :  { %v3288_v15 = vpop.f32.mrf.mxu0 }
  0xf4   :  { %v3290_v16 = vpop.f32.mrf.mxu0 }
  0xf5   :  { %312 = vrot.lane.b32.xlu0 %v3290_v16, %s3171_s19 }
  0xf6   :  { %v3294_v17 = vpop.f32.mrf.mxu0 }
  0xf7   :  { %318 = vrot.lane.b32.xlu1 %v3294_v17, %s3171_s19  ;;  %v687_v31 = vpack.c.bf16 %v3294_v17, %v3288_v15 }
  0xf8   :  { %v3298_v18 = vpop.f32.mrf.mxu0 }
  0xf9   :  { %316 = vrot.lane.b32.xlu0 %v3288_v15, %s3171_s19  ;;  %v686_v32 = vpack.c.bf16 %v3298_v18, %v3290_v16 }
  0xfa   :  { %v3302_v19 = vpop.f32.mrf.mxu0 }
  0xfb   :  { %314 = vrot.lane.b32.xlu1 %v3298_v18, %s3171_s19 }
  0xfc   :  { %v3306_v20 = vpop.f32.mrf.mxu0 }
  0xfd   :  { %320 = vrot.lane.b32.xlu0 %v3306_v20, %s3171_s19 }
  0xfe   :  { %v3310_v21 = vpop.f32.mrf.mxu0 }
  0xff   :  { %326 = vrot.lane.b32.xlu1 %v3310_v21, %s3171_s19  ;;  %v689_v29 = vpack.c.bf16 %v3310_v21, %v3302_v19 }
 0x100   :  { %v3314_v22 = vpop.f32.mrf.mxu0 }
 0x101   :  { %324 = vrot.lane.b32.xlu0 %v3302_v19, %s3171_s19  ;;  %v688_v30 = vpack.c.bf16 %v3314_v22, %v3306_v20 }
 0x102   :  { %v3318_v23 = vpop.f32.mrf.mxu0 }
 0x103   :  { %322 = vrot.lane.b32.xlu1 %v3314_v22, %s3171_s19 }
 0x104   :  { %v3322_v24 = vpop.f32.mrf.mxu0 }
 0x105   :  { %328 = vrot.lane.b32.xlu0 %v3322_v24, %s3171_s19 }
 0x106   :  { %v3326_v25 = vpop.f32.mrf.mxu0 }
 0x107   :  { %389 = vperm.xlu1 %2872, %v3284_v14   ;;  %v691_v26 = vpack.c.bf16 %v3326_v25, %v3318_v23 }
 0x108   :  { %v3331_v27 = vpop.f32.mrf.mxu0 }
 0x109   :  { %332 = vrot.lane.b32.xlu0 %v3318_v23, %s3171_s19  ;;  %2687 = vmatprep.subr.bf16.mxu1 %v691_v26  ;;  %v690_v28 = vpack.c.bf16 %v3331_v27, %v3322_v24 }
 0x10a   :  { %2688 = vmatpush3.bf16.msra.mxu1 %v691_v26  ;;  %v3392_v26 = vunpack.c.h.bf16 %v2537_v0 }
 0x10b   :  { %393 = vperm.xlu1 %2872, %v3272_v11   ;;  %2689 = vmatprep.subr.bf16.mxu1 %v690_v28 }
 0x10d   :  { %385 = vperm.xlu0 %2871, %v3276_v12  }
 0x10e   :  { %2690 = vmatpush3.bf16.msra.mxu1 %v690_v28 }
 0x10f   :  { %401 = vperm.xlu1 %2872, %v3290_v16   ;;  %2691 = vmatprep.subr.bf16.mxu1 %v689_v29 }
 0x111   :  { %397 = vperm.xlu0 %2871, %v3280_v13  }
 0x112   :  { %2692 = vmatpush3.bf16.msra.mxu1 %v689_v29  ;;  %v2568_v29 = vld [vmem:[%s4360_s1 + $0x8] sm:$0xff]  }
 0x113   :  { %409 = vperm.xlu1 %2872, %v3288_v15   ;;  %2693 = vmatprep.subr.bf16.mxu1 %v688_v30 }
 0x115   :  { %405 = vperm.xlu0 %2871, %v3298_v18  }
 0x116   :  { %2694 = vmatpush3.bf16.msra.mxu1 %v688_v30 }
 0x117   :  { %417 = vperm.xlu1 %2872, %v3306_v20   ;;  %2695 = vmatprep.subr.bf16.mxu1 %v687_v31 }
 0x119   :  { %413 = vperm.xlu0 %2871, %v3294_v17  }
 0x11a   :  { %2696 = vmatpush3.bf16.msra.mxu1 %v687_v31 }
 0x11b   :  { %425 = vperm.xlu1 %2872, %v3302_v19   ;;  %2697 = vmatprep.subr.bf16.mxu1 %v686_v32 }
 0x11d   :  { %421 = vperm.xlu0 %2871, %v3314_v22  }
 0x11e   :  { %2698 = vmatpush3.bf16.msra.mxu1 %v686_v32 }
 0x11f   :  { %441 = vperm.xlu1 %2872, %v3318_v23   ;;  %2699 = vmatprep.subr.bf16.mxu1 %v685_v33 }
 0x121   :  { %429 = vperm.xlu0 %2871, %v3310_v21  }
 0x122   :  { %2700 = vmatpush3.bf16.msra.mxu1 %v685_v33  ;;  %v3402_v33 = vunpack.c.l.bf16 %v2568_v29 }
 0x123   :  { %433 = vperm.xlu1 %2872, %v3322_v24   ;;  %2701 = vmatprep.subr.bf16.mxu1 %v684_v34 }
 0x125   :  { %445 = vperm.xlu0 %2871, %v3326_v25  }
 0x126   :  { %2702 = vmatpush3.bf16.msra.mxu1 %v684_v34 }
 0x127   :  { %334 = vrot.lane.b32.xlu1 %v3326_v25, %s3171_s19 }
 0x129   :  { %437 = vperm.xlu0 %2871, %v3331_v27  }
 0x12b   :  { %330 = vrot.lane.b32.xlu1 %v3331_v27, %s3171_s19 }
 0x15d   :  { %v309_v36 = vpop.permute.xlu1 %308 }
 0x15f   :  { %v305_v35 = vpop.permute.xlu0 %304 }
 0x160   :  { %352 = vxpose.xlu1.b32.start [1/16] (narrow) %v305_v35, 8 }
 0x161   :  { %v311_v38 = vpop.permute.xlu1 %310 }
 0x163   :  { %v307_v37 = vpop.permute.xlu0 %306 }
 0x164   :  { %353 = vxpose.xlu1.b32.cont [2/16] (narrow) %v307_v37, 8 }
 0x167   :  { %v313_v40 = vpop.permute.xlu0 %312 }
 0x168   :  { %354 = vxpose.xlu1.b32.cont [3/16] (narrow) %v309_v36, 8 }
 0x169   :  { %v319_v39 = vpop.permute.xlu1 %318 }
 0x16b   :  { %v317_v42 = vpop.permute.xlu0 %316 }
 0x16c   :  { %355 = vxpose.xlu1.b32.cont [4/16] (narrow) %v311_v38, 8 }
 0x16d   :  { %v315_v41 = vpop.permute.xlu1 %314 }
 0x16f   :  { %v321_v45 = vpop.permute.xlu0 %320 }
 0x170   :  { %356 = vxpose.xlu1.b32.cont [5/16] (narrow) %v313_v40, 8 }
 0x171   :  { %v327_v43 = vpop.permute.xlu1 %326 }
 0x173   :  { %v325_v48 = vpop.permute.xlu0 %324 }
 0x174   :  { %357 = vxpose.xlu1.b32.cont [6/16] (narrow) %v315_v41, 8  ;;  %v2569_v41 = vld [vmem:[%s4360_s1 + $0x10] sm:$0xff]  }
 0x175   :  { %v323_v44 = vpop.permute.xlu1 %322 }
 0x177   :  { %v329_v51 = vpop.permute.xlu0 %328 }
 0x178   :  { %358 = vxpose.xlu1.b32.cont [7/16] (narrow) %v317_v42, 8 }
 0x17b   :  { %v333_v58 = vpop.permute.xlu0 %332 }
 0x17c   :  { %359 = vxpose.xlu1.b32.cont [8/16] (narrow) %v319_v39, 8  ;;  %v3409_v39 = vunpack.c.h.bf16 %v2568_v29 }
 0x180   :  { %360 = vxpose.xlu1.b32.cont [9/16] (narrow) %v321_v45, 8  ;;  %v3419_v45 = vunpack.c.l.bf16 %v2569_v41 }
 0x182   :  { %v390_v46 = vpop.permute.xlu1 %389 }
 0x184   :  { %361 = vxpose.xlu1.b32.cont [10/16] (narrow) %v323_v44, 8 }
 0x186   :  { %v394_v47 = vpop.permute.xlu1 %393 }
 0x188   :  { %362 = vxpose.xlu1.b32.cont [11/16] (narrow) %v325_v48, 8  ;;  %v386_v1 = vpop.permute.xlu0 %385 }
 0x18a   :  { %v402_v49 = vpop.permute.xlu1 %401 }
 0x18c   :  { %363 = vxpose.xlu1.b32.cont [12/16] (narrow) %v327_v43, 8  ;;  %v398_v9 = vpop.permute.xlu0 %397 }
 0x18e   :  { %v410_v50 = vpop.permute.xlu1 %409 }
 0x190   :  { %364 = vxpose.xlu1.b32.cont [13/16] (narrow) %v329_v51, 8  ;;  %v406_v37 = vpop.permute.xlu0 %405 }
 0x192   :  { %v3368_v52 = vpop.permute.xlu1 %417 }
 0x196   :  { %v3370_v53 = vpop.permute.xlu1 %425 }
 0x19a   :  { %v3372_v54 = vpop.permute.xlu1 %441 }
 0x19e   :  { %v3374_v55 = vpop.permute.xlu1 %433 }
 0x1a2   :  { %v335_v56 = vpop.permute.xlu1 %334 }
 0x1a6   :  { %v331_v57 = vpop.permute.xlu1 %330 }
 0x1a7   :  { %365 = vxpose.xlu1.b32.cont [14/16] (narrow) %v331_v57, 8 }
 0x1ab   :  { %366 = vxpose.xlu1.b32.cont [15/16] (narrow) %v333_v58, 8  ;;  %v2570_v58 = vld [vmem:[%s4360_s1 + $0x18] sm:$0xff]  }
 0x1af   :  { %367 = vxpose.xlu1.b32.end [16/16] (narrow) %v335_v56, 8  ;;  %v3426_v56 = vunpack.c.h.bf16 %v2569_v41  ;;  %v2572_v41 = vld [vmem:[%s4360_s1 + $0x28] sm:$0xff]  }
 0x1ef   :  { %v368_v62 = vpop.trf.xlu1 }
 0x1f0   :  { %v3379_v63 = vrot.slane %v368_v62, %v3376_v61  ;;  %v3436_v62 = vunpack.c.l.bf16 %v2570_v58 }
 0x1f2   :  { %v452_v2 = vadd.f32 %v3379_v63, %v386_v1  ;;  %v453_v3 = vadd.f32 %v3379_v63, %v390_v46  ;;  %v454_v7 = vadd.f32 %v3379_v63, %v394_v47  ;;  %v455_v31 = vadd.f32 %v3379_v63, %v398_v9 }
 0x1f3   :  { %v456_v36 = vadd.f32 %v3379_v63, %v402_v49  ;;  %v457_v43 = vadd.f32 %v3379_v63, %v406_v37  ;;  %v458_v48 = vadd.f32 %v3379_v63, %v410_v50  ;;  %v414_v49 = vpop.permute.xlu0 %413 }
 0x1f4   :  { %vm468_vm2 = vcmp.gt.f32.partialorder %v452_v2, 0.0  ;;  %v484_v5 = vmul.f32 0.2, %v452_v2  ;;  %v485_v6 = vmul.f32 0.2, %v453_v3  ;;  %vm469_vm3 = vcmp.gt.f32.partialorder %v453_v3, 0.0 }
 0x1f5   :  { %v486_v30 = vmul.f32 0.2, %v454_v7  ;;  %vm470_vm4 = vcmp.gt.f32.partialorder %v454_v7, 0.0  ;;  %v487_v35 = vmul.f32 0.2, %v455_v31  ;;  %vm471_vm5 = vcmp.gt.f32.partialorder %v455_v31, 0.0 }
 0x1f6   :  { %v500_v8 = vsel %vm468_vm2, %v452_v2, %v484_v5  ;;  %v501_v28 = vsel %vm469_vm3, %v453_v3, %v485_v6  ;;  %v488_v42 = vmul.f32 0.2, %v456_v36  ;;  %vm472_vm6 = vcmp.gt.f32.partialorder %v456_v36, 0.0 }
 0x1f7   :  { %v3390_v10 = vadd.f32 %v3386_v4, %v500_v8  ;;  %v3400_v32 = vadd.f32 %v3392_v26, %v501_v28  ;;  %v502_v34 = vsel %vm470_vm4, %v454_v7, %v486_v30  ;;  %v503_v40 = vsel %vm471_vm5, %v455_v31, %v487_v35  ;;  %v422_v3 = vpop.permute.xlu0 %421  ;;  %v2571_v8 = vld [vmem:[%s4360_s1 + $0x20] sm:$0xff]  }
 0x1f8   :  { %v3407_v38 = vadd.f32 %v3402_v33, %v502_v34  ;;  %v3417_v44 = vadd.f32 %v3409_v39, %v503_v40  ;;  %v504_v46 = vsel %vm472_vm6, %v456_v36, %v488_v42  ;;  %v489_v47 = vmul.f32 0.2, %v457_v43 }
 0x1f9   :  { %532 = vmax.xlane.f32.xlu0 %v3390_v10  ;;  %vm473_vm7 = vcmp.gt.f32.partialorder %v457_v43, 0.0  ;;  %v3424_v51 = vadd.f32 %v3419_v45, %v504_v46  ;;  %v490_v59 = vmul.f32 0.2, %v458_v48  ;;  %v459_v60 = vadd.f32 %v3379_v63, %v414_v49 }
 0x1fa   :  { %v505_v57 = vsel %vm473_vm7, %v457_v43, %v489_v47  ;;  %vm474_vm8 = vcmp.gt.f32.partialorder %v458_v48, 0.0  ;;  %v460_v2 = vadd.f32 %v3379_v63, %v3368_v52  ;;  %v3444_v6 = vunpack.c.h.bf16 %v2570_v58 }
 0x1fb   :  { %v3434_v50 = vadd.f32 %v3426_v56, %v505_v57  ;;  %v506_v0 = vsel %vm474_vm8, %v458_v48, %v490_v59  ;;  %v491_v1 = vmul.f32 0.2, %v459_v60  ;;  %vm475_vm9 = vcmp.gt.f32.partialorder %v459_v60, 0.0  ;;  %v430_v52 = vpop.permute.xlu0 %429 }
 0x1fc   :  { %v3442_v5 = vadd.f32 %v3436_v62, %v506_v0  ;;  %v492_v9 = vmul.f32 0.2, %v460_v2  ;;  %v461_v28 = vadd.f32 %v3379_v63, %v422_v3  ;;  %vm476_vm10 = vcmp.gt.f32.partialorder %v460_v2, 0.0 }
 0x1fd   :  { %534 = vmax.xlane.f32.xlu0 %v3400_v32  ;;  %v507_v7 = vsel %vm475_vm9, %v459_v60, %v491_v1  ;;  %v3454_v30 = vunpack.c.l.bf16 %v2571_v8  ;;  %v462_v35 = vadd.f32 %v3379_v63, %v3370_v53  ;;  %v3462_v37 = vunpack.c.h.bf16 %v2571_v8  ;;  %v2573_v1 = vld [vmem:[%s4360_s1 + $0x30] sm:$0xff]  }
 0x1fe   :  { %v3452_v29 = vadd.f32 %v3444_v6, %v507_v7  ;;  %v508_v31 = vsel %vm476_vm10, %v460_v2, %v492_v9  ;;  %v493_v34 = vmul.f32 0.2, %v461_v28  ;;  %vm477_vm11 = vcmp.gt.f32.partialorder %v461_v28, 0.0 }
 0x1ff   :  { %v3460_v36 = vadd.f32 %v3454_v30, %v508_v31  ;;  %v494_v42 = vmul.f32 0.2, %v462_v35  ;;  %v463_v43 = vadd.f32 %v3379_v63, %v430_v52  ;;  %v446_v46 = vpop.permute.xlu0 %445  ;;  %vm478_vm12 = vcmp.gt.f32.partialorder %v462_v35, 0.0 }
 0x200   :  { %v509_v40 = vsel %vm477_vm11, %v461_v28, %v493_v34  ;;  %v3472_v47 = vunpack.c.l.bf16 %v2572_v41  ;;  %v464_v57 = vadd.f32 %v3379_v63, %v3374_v55  ;;  %v3480_v60 = vunpack.c.h.bf16 %v2572_v41 }
 0x201   :  { %536 = vmax.xlane.f32.xlu0 %v3407_v38  ;;  %v3470_v53 = vadd.f32 %v3462_v37, %v509_v40  ;;  %v510_v48 = vsel %vm478_vm12, %v462_v35, %v494_v42  ;;  %v495_v49 = vmul.f32 0.2, %v463_v43  ;;  %vm479_vm13 = vcmp.gt.f32.partialorder %v463_v43, 0.0  ;;  %v2574_v35 = vld [vmem:[%s4360_s1 + $0x38] sm:$0xff]  }
 0x202   :  { %v3478_v59 = vadd.f32 %v3472_v47, %v510_v48  ;;  %v496_v2 = vmul.f32 0.2, %v464_v57  ;;  %vm480_vm14 = vcmp.gt.f32.partialorder %v464_v57, 0.0  ;;  %v3490_v7 = vunpack.c.l.bf16 %v2573_v1 }
 0x203   :  { %v438_v58 = vpop.permute.xlu0 %437  ;;  %v511_v0 = vsel %vm479_vm13, %v463_v43, %v495_v49  ;;  %v466_v28 = vadd.f32 %v3379_v63, %v3372_v54  ;;  %v3498_v31 = vunpack.c.h.bf16 %v2573_v1  ;;  %v467_v41 = vadd.f32 %v3379_v63, %v446_v46 }
 0x204   :  { %v465_v3 = vadd.f32 %v3379_v63, %v438_v58  ;;  %v3488_v55 = vadd.f32 %v3480_v60, %v511_v0  ;;  %v512_v8 = vsel %vm480_vm14, %v464_v57, %v496_v2  ;;  %v3508_v42 = vunpack.c.l.bf16 %v2574_v35 }
 0x205   :  { %538 = vmax.xlane.f32.xlu0 %v3417_v44  ;;  %v3496_v52 = vadd.f32 %v3490_v7, %v512_v8  ;;  %v498_v40 = vmul.f32 0.2, %v466_v28  ;;  %vm482_vm0 = vcmp.gt.f32.partialorder %v466_v28, 0.0  ;;  %v499_v48 = vmul.f32 0.2, %v467_v41 }
 0x206   :  { %v497_v9 = vmul.f32 0.2, %v465_v3  ;;  %vm481_vm15 = vcmp.gt.f32.partialorder %v465_v3, 0.0  ;;  %vm483_vm1 = vcmp.gt.f32.partialorder %v467_v41, 0.0  ;;  %v3514_v57 = vunpack.c.h.bf16 %v2574_v35 }
 0x207   :  { %v514_v43 = vsel %vm482_vm0, %v466_v28, %v498_v40  ;;  %v515_v58 = vsel %vm483_vm1, %v467_v41, %v499_v48  ;;  %vm820_vm2 = vcmask 261120  }
 0x208   :  { %v513_v34 = vsel %vm481_vm15, %v465_v3, %v497_v9  ;;  %v3512_v49 = vadd.f32 %v3508_v42, %v514_v43  ;;  %v3518_v63 = vadd.f32 %v3514_v57, %v515_v58 }
 0x209   :  { %540 = vmax.xlane.f32.xlu0 %v3424_v51  ;;  %v3506_v54 = vadd.f32 %v3498_v31, %v513_v34 }
 0x20d   :  { %542 = vmax.xlane.f32.xlu0 %v3434_v50 }
 0x211   :  { %544 = vmax.xlane.f32.xlu0 %v3442_v5 }
 0x215   :  { %546 = vmax.xlane.f32.xlu0 %v3452_v29 }
 0x219   :  { %548 = vmax.xlane.f32.xlu0 %v3460_v36 }
 0x21d   :  { %550 = vmax.xlane.f32.xlu0 %v3470_v53 }
 0x221   :  { %552 = vmax.xlane.f32.xlu0 %v3478_v59 }
 0x225   :  { %554 = vmax.xlane.f32.xlu0 %v3488_v55 }
 0x229   :  { %556 = vmax.xlane.f32.xlu0 %v3496_v52 }
 0x22d   :  { %558 = vmax.xlane.f32.xlu0 %v3506_v54 }
 0x231   :  { %560 = vmax.xlane.f32.xlu0 %v3512_v49 }
 0x235   :  { %562 = vmax.xlane.f32.xlu0 %v3518_v63 }
 0x282   :  { %v533_v46 = vpop.xlane.xlu0 %532 }
 0x283   :  { %v564_v0 = vsub.f32 %v3390_v10, %v533_v46 }
 0x285   :  { %v580_v1 = vmul.f32 1.442695, %v564_v0 }
 0x286   :  { %v535_v2 = vpop.xlane.xlu0 %534 }
 0x287   :  { %2887 = vpow2.f32 %v580_v1  ;;  %v565_v3 = vsub.f32 %v3400_v32, %v535_v2 }
 0x289   :  { %v582_v8 = vmul.f32 1.442695, %v565_v3 }
 0x28a   :  { %v537_v9 = vpop.xlane.xlu0 %536 }
 0x28b   :  { %2889 = vpow2.f32 %v582_v8  ;;  %v566_v28 = vsub.f32 %v3407_v38, %v537_v9 }
 0x28d   :  { %v584_v34 = vmul.f32 1.442695, %v566_v28 }
 0x28e   :  { %v539_v35 = vpop.xlane.xlu0 %538 }
 0x28f   :  { %2891 = vpow2.f32 %v584_v34  ;;  %v567_v40 = vsub.f32 %v3417_v44, %v539_v35 }
 0x291   :  { %v586_v41 = vmul.f32 1.442695, %v567_v40 }
 0x292   :  { %v541_v43 = vpop.xlane.xlu0 %540 }
 0x293   :  { %2893 = vpow2.f32 %v586_v41  ;;  %v568_v10 = vsub.f32 %v3424_v51, %v541_v43 }
 0x294   :  { %v3526_v48 = vpop.eup %2887 }
 0x295   :  { %v588_v58 = vmul.f32 1.442695, %v568_v10  ;;  %612 = vadd.xlane.f32.xlu0 %v3526_v48 }
 0x296   :  { %v543_v32 = vpop.xlane.xlu0 %542 }
 0x297   :  { %2895 = vpow2.f32 %v588_v58  ;;  %v569_v46 = vsub.f32 %v3434_v50, %v543_v32 }
 0x298   :  { %v3530_v38 = vpop.eup %2889 }
 0x299   :  { %v590_v0 = vmul.f32 1.442695, %v569_v46  ;;  %614 = vadd.xlane.f32.xlu0 %v3530_v38 }
 0x29a   :  { %v545_v44 = vpop.xlane.xlu0 %544 }
 0x29b   :  { %2897 = vpow2.f32 %v590_v0  ;;  %v570_v1 = vsub.f32 %v3442_v5, %v545_v44 }
 0x29c   :  { %v3534_v2 = vpop.eup %2891 }
 0x29d   :  { %v592_v51 = vmul.f32 1.442695, %v570_v1  ;;  %616 = vadd.xlane.f32.xlu1 %v3534_v2 }
 0x29e   :  { %v547_v3 = vpop.xlane.xlu0 %546 }
 0x29f   :  { %2899 = vpow2.f32 %v592_v51  ;;  %v571_v8 = vsub.f32 %v3452_v29, %v547_v3 }
 0x2a0   :  { %v3538_v9 = vpop.eup %2893 }
 0x2a1   :  { %v594_v50 = vmul.f32 1.442695, %v571_v8  ;;  %618 = vadd.xlane.f32.xlu0 %v3538_v9 }
 0x2a2   :  { %v549_v28 = vpop.xlane.xlu0 %548 }
 0x2a3   :  { %2901 = vpow2.f32 %v594_v50  ;;  %v572_v34 = vsub.f32 %v3460_v36, %v549_v28 }
 0x2a4   :  { %v3542_v35 = vpop.eup %2895 }
 0x2a5   :  { %v596_v5 = vmul.f32 1.442695, %v572_v34  ;;  %620 = vadd.xlane.f32.xlu0 %v3542_v35 }
 0x2a6   :  { %v551_v40 = vpop.xlane.xlu0 %550 }
 0x2a7   :  { %2903 = vpow2.f32 %v596_v5  ;;  %v573_v41 = vsub.f32 %v3470_v53, %v551_v40 }
 0x2a8   :  { %v3546_v43 = vpop.eup %2897 }
 0x2a9   :  { %v598_v29 = vmul.f32 1.442695, %v573_v41  ;;  %622 = vadd.xlane.f32.xlu0 %v3546_v43 }
 0x2aa   :  { %v553_v10 = vpop.xlane.xlu0 %552 }
 0x2ab   :  { %2905 = vpow2.f32 %v598_v29  ;;  %v574_v58 = vsub.f32 %v3478_v59, %v553_v10 }
 0x2ac   :  { %v3550_v32 = vpop.eup %2899 }
 0x2ad   :  { %v600_v36 = vmul.f32 1.442695, %v574_v58  ;;  %624 = vadd.xlane.f32.xlu0 %v3550_v32 }
 0x2ae   :  { %v555_v46 = vpop.xlane.xlu0 %554 }
 0x2af   :  { %2907 = vpow2.f32 %v600_v36  ;;  %v575_v0 = vsub.f32 %v3488_v55, %v555_v46 }
 0x2b0   :  { %v3554_v44 = vpop.eup %2901 }
 0x2b1   :  { %v602_v53 = vmul.f32 1.442695, %v575_v0  ;;  %626 = vadd.xlane.f32.xlu0 %v3554_v44  ;;  %v2884_v0 = vld [vmem:[#allocation5] sm:$0xff]  }
 0x2b2   :  { %v557_v1 = vpop.xlane.xlu0 %556 }
 0x2b3   :  { %2909 = vpow2.f32 %v602_v53  ;;  %v576_v51 = vsub.f32 %v3496_v52, %v557_v1 }
 0x2b4   :  { %v3558_v3 = vpop.eup %2903 }
 0x2b5   :  { %v604_v59 = vmul.f32 1.442695, %v576_v51  ;;  %628 = vadd.xlane.f32.xlu0 %v3558_v3 }
 0x2b6   :  { %v559_v8 = vpop.xlane.xlu0 %558 }
 0x2b7   :  { %2911 = vpow2.f32 %v604_v59  ;;  %v577_v50 = vsub.f32 %v3506_v54, %v559_v8 }
 0x2b8   :  { %v3562_v28 = vpop.eup %2905 }
 0x2b9   :  { %v606_v55 = vmul.f32 1.442695, %v577_v50  ;;  %630 = vadd.xlane.f32.xlu0 %v3562_v28 }
 0x2ba   :  { %v561_v34 = vpop.xlane.xlu0 %560 }
 0x2bb   :  { %2913 = vpow2.f32 %v606_v55  ;;  %v578_v5 = vsub.f32 %v3512_v49, %v561_v34 }
 0x2bc   :  { %v3566_v40 = vpop.eup %2907 }
 0x2bd   :  { %v608_v52 = vmul.f32 1.442695, %v578_v5  ;;  %632 = vadd.xlane.f32.xlu0 %v3566_v40 }
 0x2be   :  { %v563_v41 = vpop.xlane.xlu0 %562 }
 0x2bf   :  { %2915 = vpow2.f32 %v608_v52  ;;  %v579_v29 = vsub.f32 %v3518_v63, %v563_v41  ;;  %v2883_v63 = vld [vmem:[#allocation5 + $0x8] sm:$0xff]  }
 0x2c0   :  { %v3570_v10 = vpop.eup %2909  ;;  %2719 = vmatprep.subr.bf16.mxu0 %v2883_v63 }
 0x2c1   :  { %v610_v54 = vmul.f32 1.442695, %v579_v29  ;;  %634 = vadd.xlane.f32.xlu0 %v3570_v10  ;;  %2720 = vmatpush3.bf16.msra.mxu0 %v2883_v63 }
 0x2c2   :  { %2721 = vmatprep.subr.bf16.mxu0 %v2884_v0 }
 0x2c3   :  { %2917 = vpow2.f32 %v610_v54 }
 0x2c4   :  { %v3573_v58 = vpop.eup %2911 }
 0x2c5   :  { %636 = vadd.xlane.f32.xlu0 %v3573_v58  ;;  %2722 = vmatpush3.bf16.msra.mxu0 %v2884_v0 }
 0x2c8   :  { %v3576_v49 = vpop.eup %2913 }
 0x2c9   :  { %638 = vadd.xlane.f32.xlu1 %v3576_v49 }
 0x2cc   :  { %v3579_v36 = vpop.eup %2915 }
 0x2cd   :  { %640 = vadd.xlane.f32.xlu0 %v3579_v36 }
 0x2d0   :  { %v3582_v46 = vpop.eup %2917 }
 0x2d1   :  { %642 = vadd.xlane.f32.xlu1 %v3582_v46 }
 0x31e   :  { %v613_v53 = vpop.xlane.xlu0 %612 }
 0x31f   :  { %2919 = vrcp.f32 %v613_v53 }
 0x322   :  { %v615_v1 = vpop.xlane.xlu0 %614 }
 0x323   :  { %2921 = vrcp.f32 %v615_v1 }
 0x326   :  { %v617_v51 = vpop.xlane.xlu1 %616 }
 0x327   :  { %2923 = vrcp.f32 %v617_v51 }
 0x32a   :  { %v619_v59 = vpop.xlane.xlu0 %618 }
 0x32b   :  { %2925 = vrcp.f32 %v619_v59 }
 0x32c   :  { %v2920_v8 = vpop.eup %2919 }
 0x32d   :  { %v660_v34 = vmul.f32 %v2920_v8, %v3526_v48 }
 0x32e   :  { %v621_v50 = vpop.xlane.xlu0 %620 }
 0x32f   :  { %2927 = vrcp.f32 %v621_v50 }
 0x330   :  { %v2922_v55 = vpop.eup %2921 }
 0x331   :  { %v661_v5 = vmul.f32 %v2922_v55, %v3530_v38 }
 0x332   :  { %v623_v52 = vpop.xlane.xlu0 %622 }
 0x333   :  { %2929 = vrcp.f32 %v623_v52  ;;  %v676_v41 = vpack.c.bf16 %v661_v5, %v660_v34 }
 0x334   :  { %v2924_v29 = vpop.eup %2923 }
 0x335   :  { %2703 = vmatprep.mubr.bf16.mxu1 %v676_v41  ;;  %v662_v0 = vmul.f32 %v2924_v29, %v3534_v2 }
 0x336   :  { %v625_v54 = vpop.xlane.xlu0 %624 }
 0x337   :  { %2931 = vrcp.f32 %v625_v54 }
 0x338   :  { %v2926_v63 = vpop.eup %2925 }
 0x339   :  { %v663_v53 = vmul.f32 %v2926_v63, %v3538_v9 }
 0x33a   :  { %v627_v1 = vpop.xlane.xlu0 %626 }
 0x33b   :  { %2933 = vrcp.f32 %v627_v1  ;;  %v677_v51 = vpack.c.bf16 %v663_v53, %v662_v0 }
 0x33c   :  { %v2928_v59 = vpop.eup %2927 }
 0x33d   :  { %2704 = vmatmul.mubr.bf16.vlgmr.msra.gmra.mxu1 %v677_v51  ;;  %v664_v38 = vmul.f32 %v2928_v59, %v3542_v35 }
 0x33e   :  { %v629_v48 = vpop.xlane.xlu0 %628 }
 0x33f   :  { %2935 = vrcp.f32 %v629_v48 }
 0x340   :  { %v2930_v8 = vpop.eup %2929 }
 0x341   :  { %v665_v50 = vmul.f32 %v2930_v8, %v3546_v43 }
 0x342   :  { %v631_v55 = vpop.xlane.xlu0 %630 }
 0x343   :  { %2937 = vrcp.f32 %v631_v55  ;;  %v678_v34 = vpack.c.bf16 %v665_v50, %v664_v38 }
 0x344   :  { %v2932_v5 = vpop.eup %2931 }
 0x345   :  { %2707 = vmatprep.mubr.bf16.mxu1 %v678_v34  ;;  %v666_v9 = vmul.f32 %v2932_v5, %v3550_v32 }
 0x346   :  { %v633_v2 = vpop.xlane.xlu0 %632 }
 0x347   :  { %2939 = vrcp.f32 %v633_v2 }
 0x348   :  { %v2934_v52 = vpop.eup %2933 }
 0x349   :  { %v667_v41 = vmul.f32 %v2934_v52, %v3554_v44 }
 0x34a   :  { %v635_v29 = vpop.xlane.xlu0 %634 }
 0x34b   :  { %2941 = vrcp.f32 %v635_v29  ;;  %v679_v54 = vpack.c.bf16 %v667_v41, %v666_v9 }
 0x34c   :  { %v2936_v63 = vpop.eup %2935 }
 0x34d   :  { %2708 = vmatmul.mubr.bf16.gmra.mxu1 %v679_v54  ;;  %v668_v43 = vmul.f32 %v2936_v63, %v3558_v3  ;;  %v2497_v63 = vld [vmem:[%s4364_s5] ss:$0 sm:$0xff] }
 0x34e   :  { %v637_v35 = vpop.xlane.xlu0 %636 }
 0x34f   :  { %2943 = vrcp.f32 %v637_v35 }
 0x350   :  { %v2938_v0 = vpop.eup %2937 }
 0x351   :  { %v669_v53 = vmul.f32 %v2938_v0, %v3562_v28 }
 0x352   :  { %v639_v1 = vpop.xlane.xlu1 %638 }
 0x353   :  { %2945 = vrcp.f32 %v639_v1  ;;  %v680_v51 = vpack.c.bf16 %v669_v53, %v668_v43 }
 0x354   :  { %v2940_v59 = vpop.eup %2939 }
 0x355   :  { %2711 = vmatprep.mubr.bf16.mxu1 %v680_v51  ;;  %v670_v44 = vmul.f32 %v2940_v59, %v3566_v40 }
 0x356   :  { %v641_v32 = vpop.xlane.xlu0 %640 }
 0x357   :  { %2947 = vrcp.f32 %v641_v32 }
 0x358   :  { %v2942_v48 = vpop.eup %2941 }
 0x359   :  { %v671_v8 = vmul.f32 %v2942_v48, %v3570_v10 }
 0x35a   :  { %v643_v38 = vpop.xlane.xlu1 %642 }
 0x35b   :  { %2949 = vrcp.f32 %v643_v38  ;;  %v681_v50 = vpack.c.bf16 %v671_v8, %v670_v44 }
 0x35c   :  { %v2944_v55 = vpop.eup %2943 }
 0x35d   :  { %2712 = vmatmul.mubr.bf16.gmra.mxu1 %v681_v50  ;;  %v672_v28 = vmul.f32 %v2944_v55, %v3573_v58 }
 0x360   :  { %v2946_v3 = vpop.eup %2945 }
 0x361   :  { %v673_v34 = vmul.f32 %v2946_v3, %v3576_v49 }
 0x363   :  { %v682_v5 = vpack.c.bf16 %v673_v34, %v672_v28 }
 0x364   :  { %v2948_v2 = vpop.eup %2947 }
 0x365   :  { %2715 = vmatprep.mubr.bf16.mxu1 %v682_v5  ;;  %v674_v9 = vmul.f32 %v2948_v2, %v3579_v36 }
 0x368   :  { %v2950_v52 = vpop.eup %2949 }
 0x369   :  { %v675_v40 = vmul.f32 %v2950_v52, %v3582_v46 }
 0x36b   :  { %v683_v41 = vpack.c.bf16 %v675_v40, %v674_v9 }
 0x36d   :  { %2716 = vmatmul.mubr.bf16.gmra.mxu1 %v683_v41 }
 0x3fd   :  { %v2705_v10 = vpop.f32.mrf.mxu1 }
 0x3fe   :  { %v3610_v43 = vadd.f32 %v2705_v10, %v2497_v63 }
 0x3ff   :  { %v733_v29 = vpop.f32.mrf.mxu1 }
 0x400   :  { %v3606_v35 = vadd.f32 %v2497_v63, %v733_v29  ;;  %4393 = vst [vmem:[#allocation15_spill] sm:$0xff] %v3610_v43 }
 0x401   :  { %v2706_v54 = vpop.f32.mrf.mxu1 }
 0x402   :  { %v3604_v58 = vadd.f32 %v2706_v54, %v2497_v63  ;;  %4391 = vst [vmem:[#allocation13_spill] sm:$0xff] %v3606_v35 }
 0x403   :  { %v736_v49 = vpop.f32.mrf.mxu1 }
 0x404   :  { %4390 = vst [vmem:[#allocation12_spill] sm:$0xff] %v3604_v58  ;;  %v3608_v0 = vadd.f32 %v2497_v63, %v736_v49  ;;  %v797_v46 = vpack.c.bf16 %v3604_v58, %v3610_v43 }
 0x406   :  { %4392 = vst [vmem:[#allocation14_spill] sm:$0xff] %v3608_v0  ;;  %v796_v36 = vpack.c.bf16 %v3608_v0, %v3606_v35 }
 0x408   :  { %2723 = vmatprep.mubr.msk.bf16.mxu0 %vm820_vm2, %v796_v36 }
 0x409   :  { %2724 = vmatmul.mubr.msk.bf16.vlgmr.msra.gmra.mxu0 %vm820_vm2, %v797_v46 }
 0x40d   :  { %v2709_v53 = vpop.f32.mrf.mxu1 }
 0x40e   :  { %v3624_v8 = vadd.f32 %v2709_v53, %v2497_v63 }
 0x40f   :  { %v749_v1 = vpop.f32.mrf.mxu1 }
 0x410   :  { %v3620_v48 = vadd.f32 %v2497_v63, %v749_v1  ;;  %4397 = vst [vmem:[#allocation19_spill] sm:$0xff] %v3624_v8 }
 0x411   :  { %v2710_v51 = vpop.f32.mrf.mxu1 }
 0x412   :  { %v3618_v59 = vadd.f32 %v2710_v51, %v2497_v63  ;;  %4395 = vst [vmem:[#allocation17_spill] sm:$0xff] %v3620_v48 }
 0x413   :  { %v752_v32 = vpop.f32.mrf.mxu1 }
 0x414   :  { %4394 = vst [vmem:[#allocation16_spill] sm:$0xff] %v3618_v59  ;;  %v3622_v44 = vadd.f32 %v2497_v63, %v752_v32  ;;  %v799_v50 = vpack.c.bf16 %v3618_v59, %v3624_v8 }
 0x416   :  { %4396 = vst [vmem:[#allocation18_spill] sm:$0xff] %v3622_v44  ;;  %v798_v38 = vpack.c.bf16 %v3622_v44, %v3620_v48 }
 0x418   :  { %2727 = vmatprep.mubr.msk.bf16.mxu0 %vm820_vm2, %v798_v38 }
 0x419   :  { %2728 = vmatmul.mubr.msk.bf16.gmra.mxu0 %vm820_vm2, %v799_v50 }
 0x41d   :  { %v2713_v55 = vpop.f32.mrf.mxu1 }
 0x41e   :  { %v3638_v9 = vadd.f32 %v2713_v55, %v2497_v63 }
 0x41f   :  { %v765_v3 = vpop.f32.mrf.mxu1 }
 0x420   :  { %v3634_v2 = vadd.f32 %v2497_v63, %v765_v3  ;;  %4401 = vst [vmem:[#allocation23_spill] sm:$0xff] %v3638_v9 }
 0x421   :  { %v2714_v28 = vpop.f32.mrf.mxu1 }
 0x422   :  { %v3632_v34 = vadd.f32 %v2714_v28, %v2497_v63  ;;  %4399 = vst [vmem:[#allocation21_spill] sm:$0xff] %v3634_v2 }
 0x423   :  { %v768_v5 = vpop.f32.mrf.mxu1 }
 0x424   :  { %4398 = vst [vmem:[#allocation20_spill] sm:$0xff] %v3632_v34  ;;  %v3636_v52 = vadd.f32 %v2497_v63, %v768_v5  ;;  %v801_v41 = vpack.c.bf16 %v3632_v34, %v3638_v9 }
 0x426   :  { %4400 = vst [vmem:[#allocation22_spill] sm:$0xff] %v3636_v52  ;;  %v800_v40 = vpack.c.bf16 %v3636_v52, %v3634_v2 }
 0x428   :  { %2731 = vmatprep.mubr.msk.bf16.mxu0 %vm820_vm2, %v800_v40 }
 0x429   :  { %2732 = vmatmul.mubr.msk.bf16.gmra.mxu0 %vm820_vm2, %v801_v41 }
 0x42d   :  { %v2717_v10 = vpop.f32.mrf.mxu1 }
 0x42e   :  { %v3652_v1 = vadd.f32 %v2717_v10, %v2497_v63 }
 0x42f   :  { %v781_v29 = vpop.f32.mrf.mxu1 }
 0x430   :  { %v3648_v46 = vadd.f32 %v2497_v63, %v781_v29  ;;  %4405 = vst [vmem:[#allocation27_spill] sm:$0xff] %v3652_v1 }
 0x431   :  { %v2718_v54 = vpop.f32.mrf.mxu1 }
 0x432   :  { %v3646_v49 = vadd.f32 %v2718_v54, %v2497_v63  ;;  %4403 = vst [vmem:[#allocation25_spill] sm:$0xff] %v3648_v46 }
 0x433   :  { %v784_v36 = vpop.f32.mrf.mxu1 }
 0x434   :  { %4402 = vst [vmem:[#allocation24_spill] sm:$0xff] %v3646_v49  ;;  %v3650_v53 = vadd.f32 %v2497_v63, %v784_v36  ;;  %v803_v32 = vpack.c.bf16 %v3646_v49, %v3652_v1 }
 0x436   :  { %4404 = vst [vmem:[#allocation26_spill] sm:$0xff] %v3650_v53  ;;  %v802_v51 = vpack.c.bf16 %v3650_v53, %v3648_v46 }
 0x438   :  { %2735 = vmatprep.mubr.msk.bf16.mxu0 %vm820_vm2, %v802_v51 }
 0x439   :  { %2736 = vmatmul.mubr.msk.bf16.gmra.mxu0 %vm820_vm2, %v803_v32 }
 0x4c9   :  { %v2725_v38 = vpop.f32.mrf.mxu0 }
 0x4ca   :  { %962 = vrot.lane.b32.xlu1 %v2725_v38, %s3171_s19 }
 0x4cb   :  { %v879_v50 = vpop.f32.mrf.mxu0 }
 0x4cc   :  { %958 = vrot.lane.b32.xlu0 %v879_v50, %s3171_s19 }
 0x4cd   :  { %v2726_v55 = vpop.f32.mrf.mxu0 }
 0x4ce   :  { %v1339_v3 = vpack.c.bf16 %v2726_v55, %v2725_v38  ;;  %1047 = vperm.xlu1 %2872, %v2725_v38  }
 0x4cf   :  { %v882_v63 = vpop.f32.mrf.mxu0 }
 0x4d0   :  { %v1338_v28 = vpack.c.bf16 %v882_v63, %v879_v50  ;;  %964 = vrot.lane.b32.xlu0 %v2726_v55, %s3171_s19 }
 0x4d2   :  { %1039 = vperm.xlu1 %2872, %v879_v50  }
 0x4d4   :  { %1043 = vperm.xlu0 %2871, %v882_v63  }
 0x4d6   :  { %960 = vrot.lane.b32.xlu1 %v882_v63, %s3171_s19 }
 0x4d9   :  { %v2729_v5 = vpop.f32.mrf.mxu0 }
 0x4da   :  { %970 = vrot.lane.b32.xlu1 %v2729_v5, %s3171_s19 }
 0x4db   :  { %v895_v40 = vpop.f32.mrf.mxu0 }
 0x4dd   :  { %v2730_v41 = vpop.f32.mrf.mxu0 }
 0x4de   :  { %966 = vrot.lane.b32.xlu1 %v895_v40, %s3171_s19  ;;  %972 = vrot.lane.b32.xlu0 %v2730_v41, %s3171_s19  ;;  %v1341_v48 = vpack.c.bf16 %v2730_v41, %v2729_v5 }
 0x4df   :  { %v898_v10 = vpop.f32.mrf.mxu0 }
 0x4e2   :  { %968 = vrot.lane.b32.xlu0 %v898_v10, %s3171_s19 }
 0x4e9   :  { %v2733_v29 = vpop.f32.mrf.mxu0 }
 0x4ea   :  { %978 = vrot.lane.b32.xlu1 %v2733_v29, %s3171_s19 }
 0x4eb   :  { %v911_v54 = vpop.f32.mrf.mxu0 }
 0x4ed   :  { %v2734_v36 = vpop.f32.mrf.mxu0 }
 0x4ee   :  { %974 = vrot.lane.b32.xlu1 %v911_v54, %s3171_s19  ;;  %980 = vrot.lane.b32.xlu0 %v2734_v36, %s3171_s19  ;;  %v1343_v43 = vpack.c.bf16 %v2734_v36, %v2733_v29 }
 0x4ef   :  { %v914_v51 = vpop.f32.mrf.mxu0 }
 0x4f0   :  { %v1342_v58 = vpack.c.bf16 %v914_v51, %v911_v54 }
 0x4f2   :  { %976 = vrot.lane.b32.xlu0 %v914_v51, %s3171_s19 }
 0x4f9   :  { %v2737_v32 = vpop.f32.mrf.mxu0 }
 0x4fa   :  { %986 = vrot.lane.b32.xlu1 %v2737_v32, %s3171_s19 }
 0x4fb   :  { %v927_v38 = vpop.f32.mrf.mxu0 }
 0x4fd   :  { %v2738_v50 = vpop.f32.mrf.mxu0 }
 0x4fe   :  { %v1345_v63 = vpack.c.bf16 %v2738_v50, %v2737_v32  ;;  %982 = vrot.lane.b32.xlu1 %v927_v38, %s3171_s19  ;;  %988 = vrot.lane.b32.xlu0 %v2738_v50, %s3171_s19 }
 0x4ff   :  { %v930_v35 = vpop.f32.mrf.mxu0 }
 0x500   :  { %v1344_v0 = vpack.c.bf16 %v930_v35, %v927_v38  ;;  %2739 = vmatprep.subr.bf16.mxu1 %v1345_v63 }
 0x501   :  { %2740 = vmatpush3.bf16.msra.mxu1 %v1345_v63  ;;  %v1340_v63 = vpack.c.bf16 %v898_v10, %v895_v40 }
 0x502   :  { %1055 = vperm.xlu1 %2872, %v895_v40   ;;  %984 = vrot.lane.b32.xlu0 %v930_v35, %s3171_s19 }
 0x503   :  { %2741 = vmatprep.subr.bf16.mxu1 %v1344_v0 }
 0x505   :  { %2742 = vmatpush3.bf16.msra.mxu1 %v1344_v0 }
 0x506   :  { %1063 = vperm.xlu1 %2872, %v2729_v5   ;;  %1051 = vperm.xlu0 %2871, %v2726_v55  }
 0x507   :  { %2743 = vmatprep.subr.bf16.mxu1 %v1343_v43 }
 0x509   :  { %2744 = vmatpush3.bf16.msra.mxu1 %v1343_v43 }
 0x50a   :  { %1071 = vperm.xlu1 %2872, %v911_v54   ;;  %1059 = vperm.xlu0 %2871, %v898_v10  }
 0x50b   :  { %2745 = vmatprep.subr.bf16.mxu1 %v1342_v58 }
 0x50d   :  { %2746 = vmatpush3.bf16.msra.mxu1 %v1342_v58 }
 0x50e   :  { %1079 = vperm.xlu1 %2872, %v2733_v29   ;;  %1067 = vperm.xlu0 %2871, %v2730_v41  }
 0x50f   :  { %2747 = vmatprep.subr.bf16.mxu1 %v1341_v48 }
 0x511   :  { %2748 = vmatpush3.bf16.msra.mxu1 %v1341_v48 }
 0x512   :  { %1087 = vperm.xlu1 %2872, %v927_v38   ;;  %1075 = vperm.xlu0 %2871, %v914_v51  }
 0x513   :  { %2749 = vmatprep.subr.bf16.mxu1 %v1340_v63 }
 0x515   :  { %2750 = vmatpush3.bf16.msra.mxu1 %v1340_v63 }
 0x516   :  { %1095 = vperm.xlu1 %2872, %v2737_v32   ;;  %1083 = vperm.xlu0 %2871, %v2734_v36  }
 0x517   :  { %2751 = vmatprep.subr.bf16.mxu1 %v1339_v3 }
 0x519   :  { %2752 = vmatpush3.bf16.msra.mxu1 %v1339_v3 }
 0x51a   :  { %1099 = vperm.xlu0 %2871, %v2738_v50   ;;  %2753 = vmatprep.subr.bf16.mxu1 %v1338_v28 }
 0x51d   :  { %2754 = vmatpush3.bf16.msra.mxu1 %v1338_v28 }
 0x51e   :  { %1091 = vperm.xlu0 %2871, %v930_v35  }
 0x53c   :  { %v963_v58 = vpop.permute.xlu1 %962 }
 0x53e   :  { %v959_v0 = vpop.permute.xlu0 %958 }
 0x53f   :  { %1006 = vxpose.xlu1.b32.start [1/16] (narrow) %v959_v0, 8 }
 0x542   :  { %v965_v5 = vpop.permute.xlu0 %964 }
 0x549   :  { %v1048_v43 = vpop.permute.xlu1 %1047 }
 0x54d   :  { %v1040_v55 = vpop.permute.xlu1 %1039 }
 0x54f   :  { %v1044_v48 = vpop.permute.xlu0 %1043 }
 0x551   :  { %v961_v40 = vpop.permute.xlu1 %960 }
 0x552   :  { %1007 = vxpose.xlu1.b32.cont [2/16] (narrow) %v961_v40, 8 }
 0x553   :  { %v973_v10 = vpop.permute.xlu0 %972 }
 0x555   :  { %v971_v41 = vpop.permute.xlu1 %970 }
 0x556   :  { %1008 = vxpose.xlu1.b32.cont [3/16] (narrow) %v963_v58, 8 }
 0x557   :  { %v969_v3 = vpop.permute.xlu0 %968 }
 0x559   :  { %v967_v29 = vpop.permute.xlu1 %966 }
 0x55a   :  { %1009 = vxpose.xlu1.b32.cont [4/16] (narrow) %v965_v5, 8 }
 0x55d   :  { %v979_v28 = vpop.permute.xlu1 %978 }
 0x55e   :  { %1010 = vxpose.xlu1.b32.cont [5/16] (narrow) %v967_v29, 8 }
 0x560   :  { %v981_v35 = vpop.permute.xlu0 %980 }
 0x561   :  { %v975_v54 = vpop.permute.xlu1 %974 }
 0x562   :  { %1011 = vxpose.xlu1.b32.cont [6/16] (narrow) %v969_v3, 8 }
 0x564   :  { %v977_v36 = vpop.permute.xlu0 %976 }
 0x566   :  { %1012 = vxpose.xlu1.b32.cont [7/16] (narrow) %v971_v41, 8 }
 0x56a   :  { %1013 = vxpose.xlu1.b32.cont [8/16] (narrow) %v973_v10, 8 }
 0x56c   :  { %v987_v51 = vpop.permute.xlu1 %986 }
 0x56e   :  { %1014 = vxpose.xlu1.b32.cont [9/16] (narrow) %v975_v54, 8 }
 0x570   :  { %v989_v32 = vpop.permute.xlu0 %988  ;;  %v983_v38 = vpop.permute.xlu1 %982 }
 0x572   :  { %1015 = vxpose.xlu1.b32.cont [10/16] (narrow) %v977_v36, 8 }
 0x574   :  { %v985_v50 = vpop.permute.xlu0 %984 }
 0x576   :  { %1016 = vxpose.xlu1.b32.cont [11/16] (narrow) %v979_v28, 8 }
 0x57a   :  { %1017 = vxpose.xlu1.b32.cont [12/16] (narrow) %v981_v35, 8 }
 0x57d   :  { %v1056_v63 = vpop.permute.xlu1 %1055 }
 0x57e   :  { %1018 = vxpose.xlu1.b32.cont [13/16] (narrow) %v983_v38, 8 }
 0x581   :  { %v1064_v0 = vpop.permute.xlu1 %1063 }
 0x582   :  { %1019 = vxpose.xlu1.b32.cont [14/16] (narrow) %v985_v50, 8 }
 0x585   :  { %v1072_v58 = vpop.permute.xlu1 %1071 }
 0x586   :  { %1020 = vxpose.xlu1.b32.cont [15/16] (narrow) %v987_v51, 8 }
 0x589   :  { %v3676_v5 = vpop.permute.xlu1 %1079 }
 0x58a   :  { %1021 = vxpose.xlu1.b32.end [16/16] (narrow) %v989_v32, 8  ;;  %v1052_v32 = vpop.permute.xlu0 %1051 }
 0x58d   :  { %v3678_v40 = vpop.permute.xlu1 %1087 }
 0x591   :  { %v3680_v41 = vpop.permute.xlu1 %1095 }
 0x5ca   :  { %v1022_v10 = vpop.trf.xlu1 }
 0x5cb   :  { %v3683_v29 = vrot.slane %v1022_v10, %v3376_v61 }
 0x5cd   :  { %v1106_v3 = vadd.f32 %v3683_v29, %v1040_v55  ;;  %v1107_v28 = vadd.f32 %v3683_v29, %v1044_v48  ;;  %v1108_v36 = vadd.f32 %v3683_v29, %v1048_v43  ;;  %v1109_v10 = vadd.f32 %v3683_v29, %v1052_v32 }
 0x5ce   :  { %v1110_v43 = vadd.f32 %v3683_v29, %v1056_v63  ;;  %v1112_v63 = vadd.f32 %v3683_v29, %v1064_v0  ;;  %v1114_v0 = vadd.f32 %v3683_v29, %v1072_v58  ;;  %v1116_v2 = vadd.f32 %v3683_v29, %v3676_v5 }
 0x5cf   :  { %vm1122_vm3 = vcmp.gt.f32.partialorder %v1106_v3, 0.0  ;;  %v1138_v35 = vmul.f32 0.2, %v1106_v3  ;;  %v1139_v54 = vmul.f32 0.2, %v1107_v28  ;;  %vm1123_vm4 = vcmp.gt.f32.partialorder %v1107_v28, 0.0 }
 0x5d0   :  { %v1140_v44 = vmul.f32 0.2, %v1108_v36  ;;  %vm1124_vm5 = vcmp.gt.f32.partialorder %v1108_v36, 0.0  ;;  %v1141_v8 = vmul.f32 0.2, %v1109_v10  ;;  %vm1125_vm6 = vcmp.gt.f32.partialorder %v1109_v10, 0.0 }
 0x5d1   :  { %v1154_v51 = vsel %vm1122_vm3, %v1106_v3, %v1138_v35  ;;  %v1155_v50 = vsel %vm1123_vm4, %v1107_v28, %v1139_v54  ;;  %v1060_v3 = vpop.permute.xlu0 %1059  ;;  %v1142_v54 = vmul.f32 0.2, %v1110_v43  ;;  %vm1126_vm7 = vcmp.gt.f32.partialorder %v1110_v43, 0.0 }
 0x5d2   :  { %v3689_v38 = vadd.f32 %v3386_v4, %v1154_v51  ;;  %v3694_v55 = vadd.f32 %v3392_v26, %v1155_v50  ;;  %v1156_v48 = vsel %vm1124_vm5, %v1108_v36, %v1140_v44  ;;  %v1157_v28 = vsel %vm1125_vm6, %v1109_v10, %v1141_v8 }
 0x5d3   :  { %v3699_v35 = vadd.f32 %v3402_v33, %v1156_v48  ;;  %v1111_v51 = vadd.f32 %v3683_v29, %v1060_v3  ;;  %v3704_v32 = vadd.f32 %v3409_v39, %v1157_v28  ;;  %v1158_v44 = vsel %vm1126_vm7, %v1110_v43, %v1142_v54 }
 0x5d4   :  { %1186 = vmax.xlane.f32.xlu0 %v3689_v38  ;;  %v3709_v48 = vadd.f32 %v3419_v45, %v1158_v44  ;;  %v1144_v10 = vmul.f32 0.2, %v1112_v63  ;;  %vm1128_vm9 = vcmp.gt.f32.partialorder %v1112_v63, 0.0  ;;  %vm1130_vm11 = vcmp.gt.f32.partialorder %v1114_v0, 0.0 }
 0x5d5   :  { %v1143_v36 = vmul.f32 0.2, %v1111_v51  ;;  %vm1127_vm8 = vcmp.gt.f32.partialorder %v1111_v51, 0.0  ;;  %v1068_v50 = vpop.permute.xlu0 %1067  ;;  %vm1132_vm13 = vcmp.gt.f32.partialorder %v1116_v2, 0.0  ;;  %v1118_v5 = vadd.f32 %v3683_v29, %v3678_v40 }
 0x5d6   :  { %v1113_v3 = vadd.f32 %v3683_v29, %v1068_v50  ;;  %v1160_v43 = vsel %vm1128_vm9, %v1112_v63, %v1144_v10  ;;  %v1120_v40 = vadd.f32 %v3683_v29, %v3680_v41 }
 0x5d7   :  { %v1159_v8 = vsel %vm1127_vm8, %v1111_v51, %v1143_v36  ;;  %v3719_v44 = vadd.f32 %v3436_v62, %v1160_v43  ;;  %v1146_v36 = vmul.f32 0.2, %v1114_v0  ;;  %vm1134_vm15 = vcmp.gt.f32.partialorder %v1118_v5, 0.0 }
 0x5d8   :  { %1188 = vmax.xlane.f32.xlu0 %v3694_v55  ;;  %v3714_v28 = vadd.f32 %v3426_v56, %v1159_v8  ;;  %v1145_v54 = vmul.f32 0.2, %v1113_v3  ;;  %vm1129_vm10 = vcmp.gt.f32.partialorder %v1113_v3, 0.0  ;;  %vm1136_vm1 = vcmp.gt.f32.partialorder %v1120_v40, 0.0 }
 0x5d9   :  { %v1076_v59 = vpop.permute.xlu0 %1075  ;;  %v1162_v10 = vsel %vm1130_vm11, %v1114_v0, %v1146_v36 }
 0x5da   :  { %v1161_v51 = vsel %vm1129_vm10, %v1113_v3, %v1145_v54  ;;  %v1115_v50 = vadd.f32 %v3683_v29, %v1076_v59  ;;  %v3730_v3 = vadd.f32 %v3454_v30, %v1162_v10  ;;  %v1148_v59 = vmul.f32 0.2, %v1116_v2 }
 0x5db   :  { %v3724_v63 = vadd.f32 %v3444_v6, %v1161_v51 }
 0x5dc   :  { %1190 = vmax.xlane.f32.xlu0 %v3699_v35  ;;  %v1147_v58 = vmul.f32 0.2, %v1115_v50  ;;  %vm1131_vm12 = vcmp.gt.f32.partialorder %v1115_v50, 0.0  ;;  %v1164_v51 = vsel %vm1132_vm13, %v1116_v2, %v1148_v59 }
 0x5dd   :  { %v1084_v8 = vpop.permute.xlu0 %1083 }
 0x5de   :  { %v1163_v43 = vsel %vm1131_vm12, %v1115_v50, %v1147_v58  ;;  %v1117_v54 = vadd.f32 %v3683_v29, %v1084_v8  ;;  %v3741_v50 = vadd.f32 %v3472_v47, %v1164_v51  ;;  %v1150_v58 = vmul.f32 0.2, %v1118_v5 }
 0x5df   :  { %v3735_v0 = vadd.f32 %v3462_v37, %v1163_v43 }
 0x5e0   :  { %1192 = vmax.xlane.f32.xlu0 %v3704_v32  ;;  %v1149_v36 = vmul.f32 0.2, %v1117_v54  ;;  %vm1133_vm14 = vcmp.gt.f32.partialorder %v1117_v54, 0.0  ;;  %v1166_v43 = vsel %vm1134_vm15, %v1118_v5, %v1150_v58 }
 0x5e1   :  { %v1100_v52 = vpop.permute.xlu0 %1099  ;;  %v3752_v51 = vadd.f32 %v3490_v7, %v1166_v43 }
 0x5e2   :  { %v1165_v8 = vsel %vm1133_vm14, %v1117_v54, %v1149_v36  ;;  %v1152_v36 = vmul.f32 0.2, %v1120_v40 }
 0x5e3   :  { %v3746_v2 = vadd.f32 %v3480_v60, %v1165_v8 }
 0x5e4   :  { %1194 = vmax.xlane.f32.xlu0 %v3709_v48  ;;  %v1168_v5 = vsel %vm1136_vm1, %v1120_v40, %v1152_v36 }
 0x5e5   :  { %v1092_v10 = vpop.permute.xlu0 %1091  ;;  %v3761_v41 = vadd.f32 %v3508_v42, %v1168_v5 }
 0x5e6   :  { %v1119_v9 = vadd.f32 %v3683_v29, %v1092_v10  ;;  %v1121_v10 = vadd.f32 %v3683_v29, %v1100_v52 }
 0x5e8   :  { %1196 = vmax.xlane.f32.xlu0 %v3714_v28  ;;  %v1151_v59 = vmul.f32 0.2, %v1119_v9  ;;  %vm1135_vm0 = vcmp.gt.f32.partialorder %v1119_v9, 0.0  ;;  %v1153_v58 = vmul.f32 0.2, %v1121_v10  ;;  %vm1137_vm3 = vcmp.gt.f32.partialorder %v1121_v10, 0.0 }
 0x5ea   :  { %v1167_v54 = vsel %vm1135_vm0, %v1119_v9, %v1151_v59  ;;  %v1169_v43 = vsel %vm1137_vm3, %v1121_v10, %v1153_v58 }
 0x5eb   :  { %v3757_v8 = vadd.f32 %v3498_v31, %v1167_v54  ;;  %v3765_v9 = vadd.f32 %v3514_v57, %v1169_v43 }
 0x5ec   :  { %1198 = vmax.xlane.f32.xlu0 %v3719_v44 }
 0x5f0   :  { %1200 = vmax.xlane.f32.xlu0 %v3724_v63 }
 0x5f4   :  { %1202 = vmax.xlane.f32.xlu0 %v3730_v3 }
 0x5f8   :  { %1204 = vmax.xlane.f32.xlu0 %v3735_v0 }
 0x5fc   :  { %1206 = vmax.xlane.f32.xlu0 %v3741_v50 }
 0x600   :  { %1208 = vmax.xlane.f32.xlu0 %v3746_v2 }
 0x604   :  { %1210 = vmax.xlane.f32.xlu0 %v3752_v51 }
 0x608   :  { %1212 = vmax.xlane.f32.xlu0 %v3757_v8 }
 0x60c   :  { %1214 = vmax.xlane.f32.xlu0 %v3761_v41 }
 0x610   :  { %1216 = vmax.xlane.f32.xlu0 %v3765_v9 }
 0x65d   :  { %v1187_v52 = vpop.xlane.xlu0 %1186 }
 0x65e   :  { %v1218_v29 = vsub.f32 %v3689_v38, %v1187_v52 }
 0x660   :  { %v1234_v59 = vmul.f32 1.442695, %v1218_v29 }
 0x661   :  { %v1189_v40 = vpop.xlane.xlu0 %1188 }
 0x662   :  { %2951 = vpow2.f32 %v1234_v59  ;;  %v1219_v54 = vsub.f32 %v3694_v55, %v1189_v40 }
 0x664   :  { %v1236_v36 = vmul.f32 1.442695, %v1219_v54 }
 0x665   :  { %v1191_v34 = vpop.xlane.xlu0 %1190 }
 0x666   :  { %2953 = vpow2.f32 %v1236_v36  ;;  %v1220_v10 = vsub.f32 %v3699_v35, %v1191_v34 }
 0x668   :  { %v1238_v5 = vmul.f32 1.442695, %v1220_v10 }
 0x669   :  { %v1193_v58 = vpop.xlane.xlu0 %1192 }
 0x66a   :  { %2955 = vpow2.f32 %v1238_v5  ;;  %v1221_v43 = vsub.f32 %v3704_v32, %v1193_v58 }
 0x66c   :  { %v1240_v46 = vmul.f32 1.442695, %v1221_v43 }
 0x66d   :  { %v1195_v53 = vpop.xlane.xlu0 %1194 }
 0x66e   :  { %2957 = vpow2.f32 %v1240_v46  ;;  %v1222_v38 = vsub.f32 %v3709_v48, %v1195_v53 }
 0x66f   :  { %v3773_v52 = vpop.eup %2951 }
 0x670   :  { %v1242_v29 = vmul.f32 1.442695, %v1222_v38  ;;  %1266 = vadd.xlane.f32.xlu0 %v3773_v52 }
 0x671   :  { %v1197_v55 = vpop.xlane.xlu0 %1196 }
 0x672   :  { %2959 = vpow2.f32 %v1242_v29  ;;  %v1223_v59 = vsub.f32 %v3714_v28, %v1197_v55 }
 0x673   :  { %v3777_v34 = vpop.eup %2953 }
 0x674   :  { %v1244_v35 = vmul.f32 1.442695, %v1223_v59  ;;  %1268 = vadd.xlane.f32.xlu0 %v3777_v34 }
 0x675   :  { %v1199_v32 = vpop.xlane.xlu0 %1198 }
 0x676   :  { %2961 = vpow2.f32 %v1244_v35  ;;  %v1224_v46 = vsub.f32 %v3719_v44, %v1199_v32 }
 0x677   :  { %v3781_v40 = vpop.eup %2955 }
 0x678   :  { %v1246_v53 = vmul.f32 1.442695, %v1224_v46  ;;  %1270 = vadd.xlane.f32.xlu1 %v3781_v40 }
 0x679   :  { %v1201_v48 = vpop.xlane.xlu0 %1200 }
 0x67a   :  { %2963 = vpow2.f32 %v1246_v53  ;;  %v1225_v54 = vsub.f32 %v3724_v63, %v1201_v48 }
 0x67b   :  { %v3785_v36 = vpop.eup %2957 }
 0x67c   :  { %v1248_v28 = vmul.f32 1.442695, %v1225_v54  ;;  %1272 = vadd.xlane.f32.xlu0 %v3785_v36 }
 0x67d   :  { %v1203_v10 = vpop.xlane.xlu0 %1202 }
 0x67e   :  { %2965 = vpow2.f32 %v1248_v28  ;;  %v1226_v5 = vsub.f32 %v3730_v3, %v1203_v10 }
 0x67f   :  { %v3789_v58 = vpop.eup %2959 }
 0x680   :  { %v1250_v44 = vmul.f32 1.442695, %v1226_v5  ;;  %1274 = vadd.xlane.f32.xlu0 %v3789_v58 }
 0x681   :  { %v1205_v43 = vpop.xlane.xlu0 %1204 }
 0x682   :  { %2967 = vpow2.f32 %v1250_v44  ;;  %v1227_v38 = vsub.f32 %v3735_v0, %v1205_v43 }
 0x683   :  { %v3793_v29 = vpop.eup %2961 }
 0x684   :  { %v1252_v63 = vmul.f32 1.442695, %v1227_v38  ;;  %1276 = vadd.xlane.f32.xlu0 %v3793_v29 }
 0x685   :  { %v1207_v55 = vpop.xlane.xlu0 %1206 }
 0x686   :  { %2969 = vpow2.f32 %v1252_v63  ;;  %v1228_v59 = vsub.f32 %v3741_v50, %v1207_v55 }
 0x687   :  { %v3797_v35 = vpop.eup %2963 }
 0x688   :  { %v1254_v3 = vmul.f32 1.442695, %v1228_v59  ;;  %1278 = vadd.xlane.f32.xlu0 %v3797_v35 }
 0x689   :  { %v1209_v32 = vpop.xlane.xlu0 %1208 }
 0x68a   :  { %2971 = vpow2.f32 %v1254_v3  ;;  %v1229_v46 = vsub.f32 %v3746_v2, %v1209_v32 }
 0x68b   :  { %v3801_v53 = vpop.eup %2965 }
 0x68c   :  { %v1256_v0 = vmul.f32 1.442695, %v1229_v46  ;;  %1280 = vadd.xlane.f32.xlu0 %v3801_v53 }
 0x68d   :  { %v1211_v48 = vpop.xlane.xlu0 %1210 }
 0x68e   :  { %2973 = vpow2.f32 %v1256_v0  ;;  %v1230_v54 = vsub.f32 %v3752_v51, %v1211_v48  ;;  %v2886_v48 = vld [vmem:[#allocation7] sm:$0xff]  }
 0x68f   :  { %v3805_v28 = vpop.eup %2967 }
 0x690   :  { %v1258_v50 = vmul.f32 1.442695, %v1230_v54  ;;  %1282 = vadd.xlane.f32.xlu0 %v3805_v28 }
 0x691   :  { %v1213_v10 = vpop.xlane.xlu0 %1212 }
 0x692   :  { %2975 = vpow2.f32 %v1258_v50  ;;  %v1231_v5 = vsub.f32 %v3757_v8, %v1213_v10 }
 0x693   :  { %v3809_v44 = vpop.eup %2969 }
 0x694   :  { %v1260_v2 = vmul.f32 1.442695, %v1231_v5  ;;  %1284 = vadd.xlane.f32.xlu0 %v3809_v44 }
 0x695   :  { %v1215_v43 = vpop.xlane.xlu0 %1214 }
 0x696   :  { %2977 = vpow2.f32 %v1260_v2  ;;  %v1232_v38 = vsub.f32 %v3761_v41, %v1215_v43 }
 0x697   :  { %v3813_v63 = vpop.eup %2971 }
 0x698   :  { %v1262_v51 = vmul.f32 1.442695, %v1232_v38  ;;  %1286 = vadd.xlane.f32.xlu0 %v3813_v63 }
 0x699   :  { %v1217_v55 = vpop.xlane.xlu0 %1216 }
 0x69a   :  { %2979 = vpow2.f32 %v1262_v51  ;;  %v1233_v59 = vsub.f32 %v3765_v9, %v1217_v55  ;;  %v2885_v9 = vld [vmem:[#allocation7 + $0x8] sm:$0xff]  }
 0x69b   :  { %v3817_v3 = vpop.eup %2973  ;;  %2771 = vmatprep.subr.bf16.mxu0 %v2885_v9 }
 0x69c   :  { %v1264_v8 = vmul.f32 1.442695, %v1233_v59  ;;  %1288 = vadd.xlane.f32.xlu0 %v3817_v3  ;;  %2772 = vmatpush3.bf16.msra.mxu0 %v2885_v9 }
 0x69d   :  { %2773 = vmatprep.subr.bf16.mxu0 %v2886_v48 }
 0x69e   :  { %2981 = vpow2.f32 %v1264_v8 }
 0x69f   :  { %v3820_v32 = vpop.eup %2975 }
 0x6a0   :  { %1290 = vadd.xlane.f32.xlu0 %v3820_v32  ;;  %2774 = vmatpush3.bf16.msra.mxu0 %v2886_v48 }
 0x6a3   :  { %v3823_v41 = vpop.eup %2977 }
 0x6a4   :  { %1292 = vadd.xlane.f32.xlu1 %v3823_v41 }
 0x6a7   :  { %v3826_v46 = vpop.eup %2979 }
 0x6a8   :  { %1294 = vadd.xlane.f32.xlu0 %v3826_v46 }
 0x6ab   :  { %v3829_v0 = vpop.eup %2981 }
 0x6ac   :  { %1296 = vadd.xlane.f32.xlu1 %v3829_v0 }
 0x6f9   :  { %v1267_v54 = vpop.xlane.xlu0 %1266 }
 0x6fa   :  { %2983 = vrcp.f32 %v1267_v54 }
 0x6fd   :  { %v1269_v50 = vpop.xlane.xlu0 %1268 }
 0x6fe   :  { %2985 = vrcp.f32 %v1269_v50 }
 0x701   :  { %v1271_v10 = vpop.xlane.xlu1 %1270 }
 0x702   :  { %2987 = vrcp.f32 %v1271_v10 }
 0x705   :  { %v1273_v5 = vpop.xlane.xlu0 %1272 }
 0x706   :  { %2989 = vrcp.f32 %v1273_v5 }
 0x707   :  { %v2984_v2 = vpop.eup %2983 }
 0x708   :  { %v1314_v51 = vmul.f32 %v2984_v2, %v3773_v52 }
 0x709   :  { %v1275_v43 = vpop.xlane.xlu0 %1274 }
 0x70a   :  { %2991 = vrcp.f32 %v1275_v43 }
 0x70b   :  { %v2986_v38 = vpop.eup %2985 }
 0x70c   :  { %v1315_v55 = vmul.f32 %v2986_v38, %v3777_v34 }
 0x70d   :  { %v1277_v59 = vpop.xlane.xlu0 %1276 }
 0x70e   :  { %2993 = vrcp.f32 %v1277_v59  ;;  %v1330_v8 = vpack.c.bf16 %v1315_v55, %v1314_v51 }
 0x70f   :  { %v2988_v9 = vpop.eup %2987 }
 0x710   :  { %2755 = vmatprep.mubr.bf16.mxu1 %v1330_v8  ;;  %v1316_v50 = vmul.f32 %v2988_v9, %v3781_v40 }
 0x711   :  { %v1279_v48 = vpop.xlane.xlu0 %1278 }
 0x712   :  { %2995 = vrcp.f32 %v1279_v48 }
 0x713   :  { %v2990_v54 = vpop.eup %2989 }
 0x714   :  { %v1317_v10 = vmul.f32 %v2990_v54, %v3785_v36 }
 0x715   :  { %v1281_v5 = vpop.xlane.xlu0 %1280 }
 0x716   :  { %2997 = vrcp.f32 %v1281_v5  ;;  %v1331_v1 = vpack.c.bf16 %v1317_v10, %v1316_v50 }
 0x717   :  { %v2992_v43 = vpop.eup %2991 }
 0x718   :  { %2756 = vmatmul.mubr.bf16.vlgmr.msra.gmra.mxu1 %v1331_v1  ;;  %v1318_v34 = vmul.f32 %v2992_v43, %v3789_v58 }
 0x719   :  { %v1283_v52 = vpop.xlane.xlu0 %1282 }
 0x71a   :  { %2999 = vrcp.f32 %v1283_v52 }
 0x71b   :  { %v2994_v2 = vpop.eup %2993 }
 0x71c   :  { %v1319_v38 = vmul.f32 %v2994_v2, %v3793_v29 }
 0x71d   :  { %v1285_v51 = vpop.xlane.xlu0 %1284 }
 0x71e   :  { %3001 = vrcp.f32 %v1285_v51  ;;  %v1332_v55 = vpack.c.bf16 %v1319_v38, %v1318_v34 }
 0x71f   :  { %v2996_v59 = vpop.eup %2995 }
 0x720   :  { %2759 = vmatprep.mubr.bf16.mxu1 %v1332_v55  ;;  %v1320_v36 = vmul.f32 %v2996_v59, %v3797_v35 }
 0x721   :  { %v1287_v40 = vpop.xlane.xlu0 %1286 }
 0x722   :  { %3003 = vrcp.f32 %v1287_v40 }
 0x723   :  { %v2998_v8 = vpop.eup %2997 }
 0x724   :  { %v1321_v1 = vmul.f32 %v2998_v8, %v3801_v53 }
 0x725   :  { %v1289_v9 = vpop.xlane.xlu0 %1288 }
 0x726   :  { %3005 = vrcp.f32 %v1289_v9  ;;  %v1333_v48 = vpack.c.bf16 %v1321_v1, %v1320_v36 }
 0x727   :  { %v3000_v54 = vpop.eup %2999 }
 0x728   :  { %2760 = vmatmul.mubr.bf16.gmra.mxu1 %v1333_v48  ;;  %v1322_v29 = vmul.f32 %v3000_v54, %v3805_v28 }
 0x729   :  { %v1291_v58 = vpop.xlane.xlu0 %1290 }
 0x72a   :  { %3007 = vrcp.f32 %v1291_v58  ;;  %v2508_v58 = vld [vmem:[%s4365_s6] ss:$0 sm:$0xff]  ;;  %s3173_s6 = smov 32  }
 0x72b   :  { %v3002_v50 = vpop.eup %3001 }
 0x72c   :  { %v1323_v10 = vmul.f32 %v3002_v50, %v3809_v44 }
 0x72d   :  { %v1293_v5 = vpop.xlane.xlu1 %1292 }
 0x72e   :  { %3009 = vrcp.f32 %v1293_v5  ;;  %v1334_v43 = vpack.c.bf16 %v1323_v10, %v1322_v29 }
 0x72f   :  { %v3004_v52 = vpop.eup %3003 }
 0x730   :  { %2763 = vmatprep.mubr.bf16.mxu1 %v1334_v43  ;;  %v1324_v53 = vmul.f32 %v3004_v52, %v3813_v63 }
 0x731   :  { %v1295_v35 = vpop.xlane.xlu0 %1294 }
 0x732   :  { %3011 = vrcp.f32 %v1295_v35 }
 0x733   :  { %v3006_v2 = vpop.eup %3005 }
 0x734   :  { %v1325_v34 = vmul.f32 %v3006_v2, %v3817_v3 }
 0x735   :  { %v1297_v38 = vpop.xlane.xlu1 %1296 }
 0x736   :  { %3013 = vrcp.f32 %v1297_v38  ;;  %v1335_v51 = vpack.c.bf16 %v1325_v34, %v1324_v53 }
 0x737   :  { %v3008_v55 = vpop.eup %3007 }
 0x738   :  { %2764 = vmatmul.mubr.bf16.gmra.mxu1 %v1335_v51  ;;  %v1326_v44 = vmul.f32 %v3008_v55, %v3820_v32 }
 0x73b   :  { %v3010_v28 = vpop.eup %3009 }
 0x73c   :  { %v1327_v59 = vmul.f32 %v3010_v28, %v3823_v41 }
 0x73e   :  { %v1336_v40 = vpack.c.bf16 %v1327_v59, %v1326_v44 }
 0x73f   :  { %v3012_v8 = vpop.eup %3011 }
 0x740   :  { %2767 = vmatprep.mubr.bf16.mxu1 %v1336_v40  ;;  %v1328_v1 = vmul.f32 %v3012_v8, %v3826_v46 }
 0x743   :  { %v3014_v36 = vpop.eup %3013 }
 0x744   :  { %v1329_v63 = vmul.f32 %v3014_v36, %v3829_v0 }
 0x746   :  { %v1337_v9 = vpack.c.bf16 %v1329_v63, %v1328_v1 }
 0x748   :  { %2768 = vmatmul.mubr.bf16.gmra.mxu1 %v1337_v9 }
 0x7d8   :  { %v2757_v3 = vpop.f32.mrf.mxu1 }
 0x7d9   :  { %v3857_v10 = vadd.f32 %v2757_v3, %v2508_v58 }
 0x7da   :  { %v1387_v48 = vpop.f32.mrf.mxu1 }
 0x7db   :  { %v3853_v50 = vadd.f32 %v2508_v58, %v1387_v48  ;;  %4409 = vst [vmem:[#allocation31_spill] sm:$0xff] %v3857_v10 }
 0x7dc   :  { %v2758_v54 = vpop.f32.mrf.mxu1 }
 0x7dd   :  { %v3851_v32 = vadd.f32 %v2758_v54, %v2508_v58  ;;  %4407 = vst [vmem:[#allocation29_spill] sm:$0xff] %v3853_v50 }
 0x7de   :  { %v1390_v41 = vpop.f32.mrf.mxu1 }
 0x7df   :  { %4406 = vst [vmem:[#allocation28_spill] sm:$0xff] %v3851_v32  ;;  %v3855_v29 = vadd.f32 %v2508_v58, %v1390_v41  ;;  %v1451_v0 = vpack.c.bf16 %v3851_v32, %v3857_v10 }
 0x7e1   :  { %4408 = vst [vmem:[#allocation30_spill] sm:$0xff] %v3855_v29  ;;  %v1450_v46 = vpack.c.bf16 %v3855_v29, %v3853_v50 }
 0x7e3   :  { %2775 = vmatprep.mubr.msk.bf16.mxu0 %vm820_vm2, %v1450_v46 }
 0x7e4   :  { %2776 = vmatmul.mubr.msk.bf16.vlgmr.msra.gmra.mxu0 %vm820_vm2, %v1451_v0 }
 0x7e8   :  { %v2761_v5 = vpop.f32.mrf.mxu1 }
 0x7e9   :  { %v3871_v38 = vadd.f32 %v2761_v5, %v2508_v58 }
 0x7ea   :  { %v1403_v43 = vpop.f32.mrf.mxu1 }
 0x7eb   :  { %v3867_v53 = vadd.f32 %v2508_v58, %v1403_v43 }
 0x7ec   :  { %v2762_v52 = vpop.f32.mrf.mxu1 }
 0x7ed   :  { %v3865_v35 = vadd.f32 %v2762_v52, %v2508_v58  ;;  %4410 = vst [vmem:[#allocation32_spill] sm:$0xff] %v3867_v53 }
 0x7ee   :  { %v1406_v2 = vpop.f32.mrf.mxu1 }
 0x7ef   :  { %v3869_v34 = vadd.f32 %v2508_v58, %v1406_v2  ;;  %v1453_v55 = vpack.c.bf16 %v3865_v35, %v3871_v38 }
 0x7f1   :  { %v1452_v51 = vpack.c.bf16 %v3869_v34, %v3867_v53 }
 0x7f3   :  { %2779 = vmatprep.mubr.msk.bf16.mxu0 %vm820_vm2, %v1452_v51 }
 0x7f4   :  { %2780 = vmatmul.mubr.msk.bf16.gmra.mxu0 %vm820_vm2, %v1453_v55 }
 0x7f8   :  { %v2765_v28 = vpop.f32.mrf.mxu1 }
 0x7f9   :  { %v3885_v63 = vadd.f32 %v2765_v28, %v2508_v58  ;;  %v3172_v28 = vmov 97  }
 0x7fa   :  { %v1419_v44 = vpop.f32.mrf.mxu1  ;;  %2874 = vset.pattern.permute.xlu0 %v3172_v28  ;;  %2873 = vset.pattern.permute.xlu1 %v3172_v28 }
 0x7fb   :  { %v3881_v36 = vadd.f32 %v2508_v58, %v1419_v44 }
 0x7fc   :  { %v2766_v59 = vpop.f32.mrf.mxu1 }
 0x7fd   :  { %v3879_v40 = vadd.f32 %v2766_v59, %v2508_v58 }
 0x7fe   :  { %v1422_v8 = vpop.f32.mrf.mxu1 }
 0x7ff   :  { %v3883_v1 = vadd.f32 %v2508_v58, %v1422_v8  ;;  %v1455_v3 = vpack.c.bf16 %v3879_v40, %v3885_v63 }
 0x801   :  { %v1454_v9 = vpack.c.bf16 %v3883_v1, %v3881_v36 }
 0x803   :  { %2783 = vmatprep.mubr.msk.bf16.mxu0 %vm820_vm2, %v1454_v9 }
 0x804   :  { %2784 = vmatmul.mubr.msk.bf16.gmra.mxu0 %vm820_vm2, %v1455_v3 }
 0x808   :  { %v2769_v48 = vpop.f32.mrf.mxu1 }
 0x809   :  { %v3899_v52 = vadd.f32 %v2769_v48, %v2508_v58 }
 0x80a   :  { %v1435_v54 = vpop.f32.mrf.mxu1 }
 0x80b   :  { %v3895_v5 = vadd.f32 %v2508_v58, %v1435_v54 }
 0x80c   :  { %v2770_v41 = vpop.f32.mrf.mxu1 }
 0x80d   :  { %v3893_v46 = vadd.f32 %v2770_v41, %v2508_v58 }
 0x80e   :  { %v1438_v0 = vpop.f32.mrf.mxu1 }
 0x80f   :  { %v3897_v43 = vadd.f32 %v2508_v58, %v1438_v0  ;;  %v1457_v51 = vpack.c.bf16 %v3893_v46, %v3899_v52 }
 0x811   :  { %v1456_v2 = vpack.c.bf16 %v3897_v43, %v3895_v5 }
 0x813   :  { %2787 = vmatprep.mubr.msk.bf16.mxu0 %vm820_vm2, %v1456_v2 }
 0x814   :  { %2788 = vmatmul.mubr.msk.bf16.gmra.mxu0 %vm820_vm2, %v1457_v51 }
 0x8a4   :  { %v2777_v55 = vpop.f32.mrf.mxu0 }
 0x8a6   :  { %v1532_v44 = vpop.f32.mrf.mxu0 }
 0x8a7   :  { %1611 = vrot.lane.b32.xlu0 %v1532_v44, %s3166_s12 }
 0x8a8   :  { %v2778_v59 = vpop.f32.mrf.mxu0 }
 0x8aa   :  { %v1535_v58 = vpop.f32.mrf.mxu0 }
 0x8ab   :  { %1617 = vrot.lane.b32.xlu0 %v2778_v59, %s3166_s12  ;;  %1613 = vrot.lane.b32.xlu1 %v1535_v58, %s3166_s12 }
 0x8af   :  { %1615 = vrot.lane.b32.xlu1 %v2777_v55, %s3166_s12 }
 0x8b4   :  { %v2781_v8 = vpop.f32.mrf.mxu0 }
 0x8b6   :  { %v1548_v9 = vpop.f32.mrf.mxu0 }
 0x8b7   :  { %1619 = vrot.lane.b32.xlu1 %v1548_v9, %s3166_s12 }
 0x8b8   :  { %v2782_v3 = vpop.f32.mrf.mxu0 }
 0x8b9   :  { %1625 = vrot.lane.b32.xlu0 %v2782_v3, %s3166_s12 }
 0x8ba   :  { %v1551_v48 = vpop.f32.mrf.mxu0 }
 0x8bb   :  { %1623 = vrot.lane.b32.xlu1 %v2781_v8, %s3166_s12 }
 0x8bd   :  { %1621 = vrot.lane.b32.xlu0 %v1551_v48, %s3166_s12 }
 0x8c4   :  { %v2785_v54 = vpop.f32.mrf.mxu0 }
 0x8c6   :  { %v1564_v41 = vpop.f32.mrf.mxu0 }
 0x8c7   :  { %1627 = vrot.lane.b32.xlu1 %v1564_v41, %s3166_s12 }
 0x8c8   :  { %v2786_v0 = vpop.f32.mrf.mxu0 }
 0x8c9   :  { %1633 = vrot.lane.b32.xlu0 %v2786_v0, %s3166_s12 }
 0x8ca   :  { %v1567_v2 = vpop.f32.mrf.mxu0 }
 0x8cb   :  { %1631 = vrot.lane.b32.xlu1 %v2785_v54, %s3166_s12 }
 0x8cd   :  { %1629 = vrot.lane.b32.xlu0 %v1567_v2, %s3166_s12 }
 0x8d4   :  { %v2789_v51 = vpop.f32.mrf.mxu0 }
 0x8d6   :  { %v1580_v55 = vpop.f32.mrf.mxu0 }
 0x8d7   :  { %1635 = vrot.lane.b32.xlu1 %v1580_v55, %s3166_s12 }
 0x8d8   :  { %v2790_v28 = vpop.f32.mrf.mxu0 }
 0x8d9   :  { %1641 = vrot.lane.b32.xlu0 %v2790_v28, %s3166_s12 }
 0x8da   :  { %v1583_v44 = vpop.f32.mrf.mxu0 }
 0x8db   :  { %1639 = vrot.lane.b32.xlu1 %v2789_v51, %s3166_s12 }
 0x8dd   :  { %1637 = vrot.lane.b32.xlu0 %v1583_v44, %s3166_s12 }
 0x919   :  { %v1612_v59 = vpop.permute.xlu0 %1611 }
 0x91a   :  { %v3924_v9 = vadd.f32 %v1612_v59, %v3276_v12 }
 0x91d   :  { %v1618_v58 = vpop.permute.xlu0 %1617  ;;  %v1614_v8 = vpop.permute.xlu1 %1613 }
 0x91e   :  { %v3927_v3 = vadd.f32 %v3280_v13, %v1618_v58  ;;  %v3930_v48 = vadd.f32 %v1614_v8, %v3284_v14 }
 0x920   :  { %1697 = vrot.lane.b32.xlu0 %v3927_v3, %s3173_s6 }
 0x921   :  { %v1616_v41 = vpop.permute.xlu1 %1615 }
 0x922   :  { %v3937_v0 = vadd.f32 %v3272_v11, %v1616_v41 }
 0x924   :  { %1695 = vrot.lane.b32.xlu1 %v3937_v0, %s3173_s6  ;;  %1693 = vrot.lane.b32.xlu0 %v3930_v48, %s3173_s6 }
 0x928   :  { %1780 = vperm.xlu1 %2873, %v3937_v0   ;;  %1776 = vperm.xlu0 %2874, %v3930_v48  }
 0x929   :  { %v1620_v13 = vpop.permute.xlu1 %1619 }
 0x92a   :  { %v3948_v14 = vadd.f32 %v1620_v13, %v3290_v16 }
 0x92b   :  { %v1626_v2 = vpop.permute.xlu0 %1625 }
 0x92c   :  { %1691 = vrot.lane.b32.xlu1 %v3924_v9, %s3173_s6  ;;  %1788 = vperm.xlu0 %2874, %v3948_v14   ;;  %v3954_v51 = vadd.f32 %v3294_v17, %v1626_v2 }
 0x92d   :  { %v1624_v11 = vpop.permute.xlu1 %1623 }
 0x92e   :  { %v3957_v55 = vadd.f32 %v3288_v15, %v1624_v11 }
 0x92f   :  { %v1622_v28 = vpop.permute.xlu0 %1621 }
 0x930   :  { %v3960_v44 = vadd.f32 %v1622_v28, %v3298_v18  ;;  %1772 = vperm.xlu1 %2873, %v3924_v9   ;;  %1705 = vrot.lane.b32.xlu0 %v3954_v51, %s3173_s6 }
 0x934   :  { %1784 = vperm.xlu1 %2873, %v3927_v3   ;;  %1701 = vrot.lane.b32.xlu0 %v3960_v44, %s3173_s6 }
 0x938   :  { %1703 = vrot.lane.b32.xlu1 %v3957_v55, %s3173_s6 }
 0x939   :  { %v1628_v15 = vpop.permute.xlu1 %1627 }
 0x93a   :  { %v1667_v2 = vadd.f32 %v1628_v15, %v3306_v20 }
 0x93b   :  { %v1634_v17 = vpop.permute.xlu0 %1633 }
 0x93c   :  { %v3975_v18 = vadd.f32 %v3310_v21, %v1634_v17  ;;  %1699 = vrot.lane.b32.xlu1 %v3948_v14, %s3173_s6 }
 0x93d   :  { %v1632_v58 = vpop.permute.xlu1 %1631 }
 0x93e   :  { %v3980_v8 = vadd.f32 %v3302_v19, %v1632_v58  ;;  %1713 = vrot.lane.b32.xlu0 %v3975_v18, %s3173_s6 }
 0x93f   :  { %v1630_v41 = vpop.permute.xlu0 %1629 }
 0x940   :  { %v1668_v13 = vadd.f32 %v1630_v41, %v3314_v22  ;;  %1711 = vrot.lane.b32.xlu1 %v3980_v8, %s3173_s6 }
 0x942   :  { %1709 = vrot.lane.b32.xlu0 %v1668_v13, %s3173_s6  ;;  %v2075_v58 = vpack.c.bf16 %v1668_v13, %v1667_v2 }
 0x944   :  { %1707 = vrot.lane.b32.xlu1 %v1667_v2, %s3173_s6 }
 0x946   :  { %1796 = vperm.xlu0 %2874, %v3957_v55  }
 0x949   :  { %v1636_v19 = vpop.permute.xlu1 %1635 }
 0x94a   :  { %1804 = vperm.xlu0 %2874, %v1667_v2   ;;  %v1671_v22 = vadd.f32 %v1636_v19, %v3322_v24 }
 0x94b   :  { %v1642_v17 = vpop.permute.xlu0 %1641 }
 0x94c   :  { %v1674_v20 = vadd.f32 %v3326_v25, %v1642_v17 }
 0x94d   :  { %v1640_v11 = vpop.permute.xlu1 %1639 }
 0x94e   :  { %v1673_v28 = vadd.f32 %v3318_v23, %v1640_v11  ;;  %1812 = vperm.xlu0 %2874, %v3980_v8  }
 0x94f   :  { %v1638_v15 = vpop.permute.xlu0 %1637 }
 0x950   :  { %1719 = vrot.lane.b32.xlu1 %v1673_v28, %s3173_s6  ;;  %v1672_v23 = vadd.f32 %v1638_v15, %v3331_v27  ;;  %v2078_v24 = vpack.c.bf16 %v1674_v20, %v1673_v28 }
 0x952   :  { %1828 = vperm.xlu0 %2874, %v1673_v28   ;;  %v2077_v25 = vpack.c.bf16 %v1672_v23, %v1671_v22 }
 0x954   :  { %1715 = vrot.lane.b32.xlu1 %v1671_v22, %s3173_s6 }
 0x956   :  { %1820 = vperm.xlu0 %2874, %v1671_v22  }
 0x958   :  { %1792 = vperm.xlu1 %2873, %v3960_v44  }
 0x95a   :  { %1721 = vrot.lane.b32.xlu0 %v1674_v20, %s3173_s6 }
 0x95c   :  { %1800 = vperm.xlu1 %2873, %v3954_v51  }
 0x95e   :  { %1717 = vrot.lane.b32.xlu0 %v1672_v23, %s3173_s6 }
 0x960   :  { %1808 = vperm.xlu1 %2873, %v1668_v13  }
 0x964   :  { %1816 = vperm.xlu1 %2873, %v3975_v18  }
 0x968   :  { %1832 = vperm.xlu1 %2873, %v1674_v20  }
 0x96c   :  { %1824 = vperm.xlu1 %2873, %v1672_v23  }
 0x970   :  { %2108 = vrot.lane.b32.xlu1 %v2078_v24, %s3166_s12 }
 0x974   :  { %2106 = vrot.lane.b32.xlu1 %v2077_v25, %s3166_s12 }
 0x978   :  { %2102 = vrot.lane.b32.xlu1 %v2075_v58, %s3166_s12 }
 0x992   :  { %v1698_v41 = vpop.permute.xlu0 %1697 }
 0x996   :  { %v1696_v27 = vpop.permute.xlu1 %1695  ;;  %v1694_v19 = vpop.permute.xlu0 %1693 }
 0x9a3   :  { %v1781_v11 = vpop.permute.xlu1 %1780  ;;  %v1777_v17 = vpop.permute.xlu0 %1776 }
 0x9a7   :  { %v1692_v15 = vpop.permute.xlu1 %1691  ;;  %v4008_v54 = vpop.permute.xlu0 %1788 }
 0x9a8   :  { %1739 = vxpose.xlu0.b32.start [1/16] (narrow) %v1692_v15, 8 }
 0x9ab   :  { %v1773_v59 = vpop.permute.xlu1 %1772  ;;  %v1706_v12 = vpop.permute.xlu0 %1705 }
 0x9ac   :  { %1740 = vxpose.xlu0.b32.cont [2/16] (narrow) %v1694_v19, 8 }
 0x9af   :  { %v1785_v28 = vpop.permute.xlu1 %1784  ;;  %v1702_v22 = vpop.permute.xlu0 %1701 }
 0x9b0   :  { %1741 = vxpose.xlu0.b32.cont [3/16] (narrow) %v1696_v27, 8 }
 0x9b3   :  { %v1704_v20 = vpop.permute.xlu1 %1703  ;;  %v1714_v13 = vpop.permute.xlu0 %1713 }
 0x9b4   :  { %1742 = vxpose.xlu0.b32.cont [4/16] (narrow) %v1698_v41, 8 }
 0x9b7   :  { %v1700_v2 = vpop.permute.xlu1 %1699  ;;  %v1710_v23 = vpop.permute.xlu0 %1709 }
 0x9b8   :  { %1743 = vxpose.xlu0.b32.cont [5/16] (narrow) %v1700_v2, 8 }
 0x9bb   :  { %v1712_v24 = vpop.permute.xlu1 %1711 }
 0x9bc   :  { %1744 = vxpose.xlu0.b32.cont [6/16] (narrow) %v1702_v22, 8 }
 0x9bf   :  { %v1708_v58 = vpop.permute.xlu1 %1707 }
 0x9c0   :  { %1745 = vxpose.xlu0.b32.cont [7/16] (narrow) %v1704_v20, 8 }
 0x9c1   :  { %v4010_v25 = vpop.permute.xlu0 %1796 }
 0x9c3   :  { %v1720_v19 = vpop.permute.xlu1 %1719 }
 0x9c4   :  { %1746 = vxpose.xlu0.b32.cont [8/16] (narrow) %v1706_v12, 8 }
 0x9c5   :  { %v4012_v15 = vpop.permute.xlu0 %1804 }
 0x9c7   :  { %v1716_v41 = vpop.permute.xlu1 %1715 }
 0x9c8   :  { %1747 = vxpose.xlu0.b32.cont [9/16] (narrow) %v1708_v58, 8 }
 0x9c9   :  { %v4014_v16 = vpop.permute.xlu0 %1812 }
 0x9cc   :  { %1748 = vxpose.xlu0.b32.cont [10/16] (narrow) %v1710_v23, 8 }
 0x9cd   :  { %v4016_v27 = vpop.permute.xlu0 %1828 }
 0x9d0   :  { %1749 = vxpose.xlu0.b32.cont [11/16] (narrow) %v1712_v24, 8 }
 0x9d1   :  { %v4018_v2 = vpop.permute.xlu0 %1820 }
 0x9d3   :  { %v1793_v22 = vpop.permute.xlu1 %1792 }
 0x9d4   :  { %1750 = vxpose.xlu0.b32.cont [12/16] (narrow) %v1714_v13, 8  ;;  %v4411_v13 = vpack.c.bf16 %v3975_v18, %v3980_v8 }
 0x9d5   :  { %v1722_v20 = vpop.permute.xlu0 %1721 }
 0x9d7   :  { %v1801_v21 = vpop.permute.xlu1 %1800 }
 0x9d8   :  { %1751 = vxpose.xlu0.b32.cont [13/16] (narrow) %v1716_v41, 8 }
 0x9d9   :  { %v1718_v49 = vpop.permute.xlu0 %1717 }
 0x9db   :  { %v4020_v12 = vpop.permute.xlu1 %1808 }
 0x9dc   :  { %1752 = vxpose.xlu0.b32.cont [14/16] (narrow) %v1718_v49, 8 }
 0x9df   :  { %v4022_v58 = vpop.permute.xlu1 %1816 }
 0x9e0   :  { %1753 = vxpose.xlu0.b32.cont [15/16] (narrow) %v1720_v19, 8 }
 0x9e3   :  { %v1833_v50 = vpop.permute.xlu1 %1832 }
 0x9e4   :  { %1754 = vxpose.xlu0.b32.end [16/16] (narrow) %v1722_v20, 8 }
 0x9e7   :  { %v4024_v23 = vpop.permute.xlu1 %1824 }
 0x9eb   :  { %v2109_v29 = vpop.permute.xlu1 %2108 }
 0x9ec   :  { %2791 = vmatprep.subr.bf16.mxu1 %v2109_v29 }
 0x9ed   :  { %2792 = vmatpush3.bf16.msra.mxu1 %v2109_v29 }
 0x9ef   :  { %v2107_v24 = vpop.permute.xlu1 %2106 }
 0x9f0   :  { %2793 = vmatprep.subr.bf16.mxu1 %v2107_v24 }
 0x9f1   :  { %2794 = vmatpush3.bf16.msra.mxu1 %v2107_v24 }
 0xa0d   :  { %2104 = vrot.lane.b32.xlu0 %v4411_v13, %s3166_s12 }
 0xa24   :  { %v1755_v41 = vpop.trf.xlu0 }
 0xa25   :  { %v4031_v49 = vrot.slane %v1755_v41, %v3376_v61 }
 0xa27   :  { %v1854_v19 = vadd.f32 %v4031_v49, %v1833_v50  ;;  %v1839_v20 = vadd.f32 %v4031_v49, %v1773_v59  ;;  %v1840_v10 = vadd.f32 %v4031_v49, %v1777_v17  ;;  %v1841_v29 = vadd.f32 %v4031_v49, %v1781_v11 }
 0xa28   :  { %v1842_v17 = vadd.f32 %v4031_v49, %v1785_v28  ;;  %v1844_v28 = vadd.f32 %v4031_v49, %v1793_v22  ;;  %v1846_v22 = vadd.f32 %v4031_v49, %v1801_v21 }
 0xa29   :  { %vm1870_vm4 = vcmp.gt.f32.partialorder %v1854_v19, 0.0  ;;  %v1886_v32 = vmul.f32 0.2, %v1854_v19  ;;  %vm1855_vm5 = vcmp.gt.f32.partialorder %v1839_v20, 0.0  ;;  %v1871_v24 = vmul.f32 0.2, %v1839_v20 }
 0xa2a   :  { %vm1856_vm6 = vcmp.gt.f32.partialorder %v1840_v10, 0.0  ;;  %v1872_v53 = vmul.f32 0.2, %v1840_v10  ;;  %v1873_v59 = vmul.f32 0.2, %v1841_v29  ;;  %vm1857_vm7 = vcmp.gt.f32.partialorder %v1841_v29, 0.0 }
 0xa2b   :  { %v1902_v18 = vsel %vm1870_vm4, %v1854_v19, %v1886_v32  ;;  %v1887_v8 = vsel %vm1855_vm5, %v1839_v20, %v1871_v24  ;;  %v1874_v41 = vmul.f32 0.2, %v1842_v17  ;;  %vm1858_vm8 = vcmp.gt.f32.partialorder %v1842_v17, 0.0 }
 0xa2c   :  { %v4038_v13 = vadd.f32 %v3514_v57, %v1902_v18  ;;  %v4041_v61 = vadd.f32 %v3386_v4, %v1887_v8  ;;  %v1888_v50 = vsel %vm1856_vm6, %v1840_v10, %v1872_v53  ;;  %v1889_v32 = vsel %vm1857_vm7, %v1841_v29, %v1873_v59 }
 0xa2d   :  { %v4047_v11 = vadd.f32 %v3392_v26, %v1888_v50  ;;  %v1843_v57 = vadd.f32 %v4031_v49, %v4008_v54  ;;  %v4053_v4 = vadd.f32 %v3402_v33, %v1889_v32  ;;  %v1890_v10 = vsel %vm1858_vm8, %v1842_v17, %v1874_v41 }
 0xa2e   :  { %1949 = vmax.xlane.f32.xlu0 %v4038_v13  ;;  %1919 = vmax.xlane.f32.xlu1 %v4041_v61  ;;  %v4058_v26 = vadd.f32 %v3409_v39, %v1890_v10  ;;  %v1876_v20 = vmul.f32 0.2, %v1844_v28  ;;  %v1845_v54 = vadd.f32 %v4031_v49, %v4010_v25  ;;  %vm1860_vm10 = vcmp.gt.f32.partialorder %v1844_v28, 0.0 }
 0xa2f   :  { %v1875_v53 = vmul.f32 0.2, %v1843_v57  ;;  %vm1859_vm9 = vcmp.gt.f32.partialorder %v1843_v57, 0.0  ;;  %v1878_v8 = vmul.f32 0.2, %v1846_v22  ;;  %v1847_v25 = vadd.f32 %v4031_v49, %v4012_v15 }
 0xa30   :  { %v1892_v29 = vsel %vm1860_vm10, %v1844_v28, %v1876_v20  ;;  %v1877_v24 = vmul.f32 0.2, %v1845_v54  ;;  %vm1861_vm11 = vcmp.gt.f32.partialorder %v1845_v54, 0.0  ;;  %vm1862_vm12 = vcmp.gt.f32.partialorder %v1846_v22, 0.0 }
 0xa31   :  { %v1891_v19 = vsel %vm1859_vm9, %v1843_v57, %v1875_v53  ;;  %v4069_v39 = vadd.f32 %v3426_v56, %v1892_v29  ;;  %v1894_v50 = vsel %vm1862_vm12, %v1846_v22, %v1878_v8  ;;  %v1879_v59 = vmul.f32 0.2, %v1847_v25 }
 0xa32   :  { %1921 = vmax.xlane.f32.xlu1 %v4047_v11  ;;  %v4064_v33 = vadd.f32 %v3419_v45, %v1891_v19  ;;  %v1893_v18 = vsel %vm1861_vm11, %v1845_v54, %v1877_v24  ;;  %v4412_v45 = vpack.c.bf16 %v3954_v51, %v3957_v55  ;;  %v1848_v56 = vadd.f32 %v4031_v49, %v4020_v12 }
 0xa33   :  { %v4079_v21 = vadd.f32 %v3436_v62, %v1893_v18  ;;  %vm1863_vm13 = vcmp.gt.f32.partialorder %v1847_v25, 0.0  ;;  %v4413_v15 = vpack.c.bf16 %v3927_v3, %v3937_v0  ;;  %v4089_v17 = vadd.f32 %v3444_v6, %v1894_v50 }
 0xa34   :  { %v1895_v51 = vsel %vm1863_vm13, %v1847_v25, %v1879_v59  ;;  %v1880_v55 = vmul.f32 0.2, %v1848_v56  ;;  %v1849_v62 = vadd.f32 %v4031_v49, %v4014_v16  ;;  %vm1864_vm14 = vcmp.gt.f32.partialorder %v1848_v56, 0.0 }
 0xa35   :  { %v4095_v12 = vadd.f32 %v3454_v30, %v1895_v51  ;;  %v1850_v3 = vadd.f32 %v4031_v49, %v4022_v58  ;;  %v1851_v16 = vadd.f32 %v4031_v49, %v4018_v2  ;;  %v1852_v58 = vadd.f32 %v4031_v49, %v4024_v23 }
 0xa36   :  { %1923 = vmax.xlane.f32.xlu1 %v4053_v4  ;;  %v1896_v32 = vsel %vm1864_vm14, %v1848_v56, %v1880_v55  ;;  %v1881_v41 = vmul.f32 0.2, %v1849_v62  ;;  %vm1865_vm15 = vcmp.gt.f32.partialorder %v1849_v62, 0.0  ;;  %v1853_v2 = vadd.f32 %v4031_v49, %v4016_v27  ;;  %v2103_v49 = vpop.permute.xlu1 %2102 }
 0xa37   :  { %v4101_v6 = vadd.f32 %v3462_v37, %v1896_v32  ;;  %v1882_v57 = vmul.f32 0.2, %v1850_v3  ;;  %vm1866_vm0 = vcmp.gt.f32.partialorder %v1850_v3, 0.0  ;;  %v1883_v53 = vmul.f32 0.2, %v1851_v16 }
 0xa38   :  { %v1897_v0 = vsel %vm1865_vm15, %v1849_v62, %v1881_v41  ;;  %vm1867_vm1 = vcmp.gt.f32.partialorder %v1851_v16, 0.0  ;;  %v1884_v19 = vmul.f32 0.2, %v1852_v58  ;;  %vm1868_vm3 = vcmp.gt.f32.partialorder %v1852_v58, 0.0 }
 0xa39   :  { %v4107_v30 = vadd.f32 %v3472_v47, %v1897_v0  ;;  %v1898_v10 = vsel %vm1866_vm0, %v1850_v3, %v1882_v57  ;;  %v1899_v28 = vsel %vm1867_vm1, %v1851_v16, %v1883_v53  ;;  %v1885_v54 = vmul.f32 0.2, %v1853_v2 }
 0xa3a   :  { %1925 = vmax.xlane.f32.xlu1 %v4058_v26  ;;  %v4113_v37 = vadd.f32 %v3480_v60, %v1898_v10  ;;  %v4119_v47 = vadd.f32 %v3490_v7, %v1899_v28  ;;  %v1900_v20 = vsel %vm1868_vm3, %v1852_v58, %v1884_v19  ;;  %vm1869_vm4 = vcmp.gt.f32.partialorder %v1853_v2, 0.0 }
 0xa3b   :  { %v4123_v23 = vadd.f32 %v3498_v31, %v1900_v20  ;;  %v1901_v60 = vsel %vm1869_vm4, %v1853_v2, %v1885_v54  ;;  %v4414_v7 = vpack.c.bf16 %v3960_v44, %v3948_v14  ;;  %vm3175_vm5 = vmmov 0  }
 0xa3c   :  { %v4127_v29 = vadd.f32 %v3508_v42, %v1901_v60  ;;  %vm2376_vm6 = vcmask 785408   ;;  %vm2359_vm7 = vcmask 523264  }
 0xa3e   :  { %1927 = vmax.xlane.f32.xlu1 %v4064_v33 }
 0xa42   :  { %1929 = vmax.xlane.f32.xlu1 %v4069_v39 }
 0xa44   :  { %2100 = vrot.lane.b32.xlu0 %v4412_v45, %s3166_s12 }
 0xa46   :  { %1931 = vmax.xlane.f32.xlu1 %v4079_v21 }
 0xa48   :  { %2096 = vrot.lane.b32.xlu0 %v4413_v15, %s3166_s12 }
 0xa4a   :  { %1933 = vmax.xlane.f32.xlu1 %v4089_v17 }
 0xa4e   :  { %1935 = vmax.xlane.f32.xlu1 %v4095_v12 }
 0xa52   :  { %1937 = vmax.xlane.f32.xlu1 %v4101_v6 }
 0xa56   :  { %1939 = vmax.xlane.f32.xlu1 %v4107_v30 }
 0xa5a   :  { %1941 = vmax.xlane.f32.xlu1 %v4113_v37 }
 0xa5e   :  { %1943 = vmax.xlane.f32.xlu1 %v4119_v47 }
 0xa62   :  { %1945 = vmax.xlane.f32.xlu1 %v4123_v23 }
 0xa66   :  { %1947 = vmax.xlane.f32.xlu1 %v4127_v29 }
 0xa77   :  { %2098 = vrot.lane.b32.xlu1 %v4414_v7, %s3166_s12 }
 0xa7f   :  { %v2105_v27 = vpop.permute.xlu0 %2104 }
 0xa80   :  { %2795 = vmatprep.subr.bf16.mxu1 %v2105_v27 }
 0xa81   :  { %2796 = vmatpush3.bf16.msra.mxu1 %v2105_v27 }
 0xa82   :  { %2797 = vmatprep.subr.bf16.mxu1 %v2103_v49 }
 0xa85   :  { %2798 = vmatpush3.bf16.msra.mxu1 %v2103_v49 }
 0xab7   :  { %v1920_v31 = vpop.xlane.xlu1 %1919  ;;  %v4134_v24 = vpop.xlane.xlu0 %1949 }
 0xab8   :  { %v1951_v22 = vsub.f32 %v4041_v61, %v1920_v31 }
 0xaba   :  { %v1967_v42 = vmul.f32 1.442695, %v1951_v22 }
 0xabb   :  { %v1922_v18 = vpop.xlane.xlu1 %1921  ;;  %v2101_v8 = vpop.permute.xlu0 %2100 }
 0xabc   :  { %3015 = vpow2.f32 %v1967_v42  ;;  %v1952_v25 = vsub.f32 %v4047_v11, %v1922_v18  ;;  %2799 = vmatprep.subr.bf16.mxu1 %v2101_v8 }
 0xabd   :  { %2800 = vmatpush3.bf16.msra.mxu1 %v2101_v8  ;;  %v1966_v8 = vsub.f32 %v4038_v13, %v4134_v24 }
 0xabe   :  { %v1969_v14 = vmul.f32 1.442695, %v1952_v25 }
 0xabf   :  { %v1924_v44 = vpop.xlane.xlu1 %1923  ;;  %v2097_v24 = vpop.permute.xlu0 %2096 }
 0xac0   :  { %3017 = vpow2.f32 %v1969_v14  ;;  %v1953_v45 = vsub.f32 %v4053_v4, %v1924_v44 }
 0xac2   :  { %v1971_v50 = vmul.f32 1.442695, %v1953_v45  ;;  %v1997_v45 = vmul.f32 1.442695, %v1966_v8 }
 0xac3   :  { %v1926_v59 = vpop.xlane.xlu1 %1925 }
 0xac4   :  { %3019 = vpow2.f32 %v1971_v50  ;;  %v1954_v56 = vsub.f32 %v4058_v26, %v1926_v59 }
 0xac6   :  { %v1973_v15 = vmul.f32 1.442695, %v1954_v56 }
 0xac7   :  { %v1928_v61 = vpop.xlane.xlu1 %1927 }
 0xac8   :  { %3021 = vpow2.f32 %v1973_v15  ;;  %v1955_v51 = vsub.f32 %v4064_v33, %v1928_v61 }
 0xac9   :  { %v4141_v55 = vpop.eup %3015 }
 0xaca   :  { %v1975_v11 = vmul.f32 1.442695, %v1955_v51  ;;  %1999 = vadd.xlane.f32.xlu1 %v4141_v55 }
 0xacb   :  { %v1930_v62 = vpop.xlane.xlu1 %1929 }
 0xacc   :  { %3023 = vpow2.f32 %v1975_v11  ;;  %v1956_v32 = vsub.f32 %v4069_v39, %v1930_v62  ;;  %v4415_v11 = vpack.c.bf16 %v3930_v48, %v3924_v9 }
 0xacd   :  { %v4145_v4 = vpop.eup %3017 }
 0xace   :  { %v1977_v41 = vmul.f32 1.442695, %v1956_v32  ;;  %2001 = vadd.xlane.f32.xlu0 %v4145_v4 }
 0xacf   :  { %v1932_v26 = vpop.xlane.xlu1 %1931 }
 0xad0   :  { %3025 = vpow2.f32 %v1977_v41  ;;  %v1957_v3 = vsub.f32 %v4079_v21, %v1932_v26 }
 0xad1   :  { %v4149_v0 = vpop.eup %3019 }
 0xad2   :  { %v1979_v33 = vmul.f32 1.442695, %v1957_v3  ;;  %2003 = vadd.xlane.f32.xlu0 %v4149_v0 }
 0xad3   :  { %v1934_v57 = vpop.xlane.xlu1 %1933 }
 0xad4   :  { %3027 = vpow2.f32 %v1979_v33  ;;  %v1958_v16 = vsub.f32 %v4089_v17, %v1934_v57 }
 0xad5   :  { %v4153_v10 = vpop.eup %3021 }
 0xad6   :  { %v1981_v39 = vmul.f32 1.442695, %v1958_v16  ;;  %2005 = vadd.xlane.f32.xlu0 %v4153_v10 }
 0xad7   :  { %v1936_v53 = vpop.xlane.xlu1 %1935 }
 0xad8   :  { %3029 = vpow2.f32 %v1981_v39  ;;  %v1959_v58 = vsub.f32 %v4095_v12, %v1936_v53 }
 0xad9   :  { %v4157_v28 = vpop.eup %3023 }
 0xada   :  { %v1983_v21 = vmul.f32 1.442695, %v1959_v58  ;;  %2007 = vadd.xlane.f32.xlu1 %v4157_v28 }
 0xadb   :  { %v1938_v19 = vpop.xlane.xlu1 %1937 }
 0xadc   :  { %3031 = vpow2.f32 %v1983_v21  ;;  %v1960_v2 = vsub.f32 %v4101_v6, %v1938_v19 }
 0xadd   :  { %v4161_v20 = vpop.eup %3025 }
 0xade   :  { %v1985_v17 = vmul.f32 1.442695, %v1960_v2  ;;  %2009 = vadd.xlane.f32.xlu0 %v4161_v20 }
 0xadf   :  { %v1940_v54 = vpop.xlane.xlu1 %1939 }
 0xae0   :  { %3033 = vpow2.f32 %v1985_v17  ;;  %v1961_v60 = vsub.f32 %v4107_v30, %v1940_v54 }
 0xae1   :  { %v4165_v7 = vpop.eup %3027 }
 0xae2   :  { %v1987_v12 = vmul.f32 1.442695, %v1961_v60  ;;  %2011 = vadd.xlane.f32.xlu1 %v4165_v7 }
 0xae3   :  { %v1942_v27 = vpop.xlane.xlu1 %1941 }
 0xae4   :  { %3035 = vpow2.f32 %v1987_v12  ;;  %v1962_v49 = vsub.f32 %v4113_v37, %v1942_v27 }
 0xae5   :  { %v4169_v31 = vpop.eup %3029 }
 0xae6   :  { %v1989_v6 = vmul.f32 1.442695, %v1962_v49  ;;  %2013 = vadd.xlane.f32.xlu0 %v4169_v31 }
 0xae7   :  { %v1944_v22 = vpop.xlane.xlu1 %1943 }
 0xae8   :  { %3037 = vpow2.f32 %v1989_v6  ;;  %v1963_v42 = vsub.f32 %v4119_v47, %v1944_v22 }
 0xae9   :  { %v4173_v18 = vpop.eup %3031 }
 0xaea   :  { %v1991_v30 = vmul.f32 1.442695, %v1963_v42  ;;  %2015 = vadd.xlane.f32.xlu1 %v4173_v18 }
 0xaeb   :  { %v1946_v25 = vpop.xlane.xlu1 %1945 }
 0xaec   :  { %3039 = vpow2.f32 %v1991_v30  ;;  %v1964_v37 = vsub.f32 %v4123_v23, %v1946_v25 }
 0xaed   :  { %v4179_v14 = vpop.eup %3033 }
 0xaee   :  { %v1993_v44 = vmul.f32 1.442695, %v1964_v37  ;;  %2017 = vadd.xlane.f32.xlu0 %v4179_v14 }
 0xaef   :  { %v1948_v50 = vpop.xlane.xlu1 %1947 }
 0xaf0   :  { %3041 = vpow2.f32 %v1993_v44  ;;  %v1965_v47 = vsub.f32 %v4127_v29, %v1948_v50 }
 0xaf1   :  { %v4183_v59 = vpop.eup %3035  ;;  %3043 = vpow2.f32 %v1997_v45 }
 0xaf2   :  { %v1995_v56 = vmul.f32 1.442695, %v1965_v47  ;;  %2019 = vadd.xlane.f32.xlu1 %v4183_v59 }
 0xaf3   :  { %v2099_v13 = vpop.permute.xlu1 %2098 }
 0xaf4   :  { %3045 = vpow2.f32 %v1995_v56  ;;  %2801 = vmatprep.subr.bf16.mxu1 %v2099_v13 }
 0xaf5   :  { %v4186_v23 = vpop.eup %3037  ;;  %2802 = vmatpush3.bf16.msra.mxu1 %v2099_v13 }
 0xaf6   :  { %2021 = vadd.xlane.f32.xlu0 %v4186_v23  ;;  %2803 = vmatprep.subr.bf16.mxu1 %v2097_v24 }
 0xaf9   :  { %v4189_v15 = vpop.eup %3039  ;;  %2804 = vmatpush3.bf16.msra.mxu1 %v2097_v24 }
 0xafa   :  { %2023 = vadd.xlane.f32.xlu1 %v4189_v15 }
 0xafd   :  { %v4192_v29 = vpop.eup %3041 }
 0xafe   :  { %2025 = vadd.xlane.f32.xlu0 %v4192_v29  ;;  %v4195_v61 = vpop.eup %3043 }
 0xb01   :  { %v4197_v51 = vpop.eup %3045 }
 0xb02   :  { %2027 = vadd.xlane.f32.xlu1 %v4197_v51  ;;  %2029 = vadd.xlane.f32.xlu0 %v4195_v61 }
 0xb13   :  { %2094 = vrot.lane.b32.xlu1 %v4415_v11, %s3166_s12 }
 0xb17   :  { %2259 = vrot.lane.b32.xlu1 %v3899_v52, %s3173_s6 }
 0xb18   :  { %2261 = vrot.lane.b32.xlu0 %v3893_v46, %s3173_s6 }
 0xb1b   :  { %2257 = vrot.lane.b32.xlu1 %v3897_v43, %s3173_s6 }
 0xb1f   :  { %2255 = vrot.lane.b32.xlu1 %v3895_v5, %s3173_s6 }
 0xb23   :  { %2253 = vrot.lane.b32.xlu1 %v3879_v40, %s3173_s6 }
 0xb27   :  { %2251 = vrot.lane.b32.xlu1 %v3885_v63, %s3173_s6 }
 0xb2b   :  { %2249 = vrot.lane.b32.xlu1 %v3883_v1, %s3173_s6 }
 0xb2f   :  { %2247 = vrot.lane.b32.xlu1 %v3881_v36, %s3173_s6 }
 0xb53   :  { %v2000_v52 = vpop.xlane.xlu1 %1999 }
 0xb54   :  { %3047 = vrcp.f32 %v2000_v52 }
 0xb57   :  { %v2002_v46 = vpop.xlane.xlu0 %2001 }
 0xb58   :  { %3049 = vrcp.f32 %v2002_v46 }
 0xb5b   :  { %v2004_v62 = vpop.xlane.xlu0 %2003 }
 0xb5f   :  { %v2006_v32 = vpop.xlane.xlu0 %2005 }
 0xb60   :  { %3051 = vrcp.f32 %v2006_v32 }
 0xb61   :  { %v3048_v43 = vpop.eup %3047 }
 0xb62   :  { %v2047_v5 = vmul.f32 %v3048_v43, %v4141_v55 }
 0xb63   :  { %v2008_v63 = vpop.xlane.xlu1 %2007 }
 0xb65   :  { %v3050_v9 = vpop.eup %3049 }
 0xb66   :  { %v2048_v48 = vmul.f32 %v3050_v9, %v4145_v4 }
 0xb67   :  { %v2010_v1 = vpop.xlane.xlu0 %2009 }
 0xb68   :  { %v2063_v40 = vpack.c.bf16 %v2048_v48, %v2047_v5  ;;  %3053 = vrcp.f32 %v2010_v1 }
 0xb69   :  { %3055 = vrcp.f32 %v2004_v62 }
 0xb6a   :  { %2807 = vmatprep.mubr.bf16.mxu1 %v2063_v40  ;;  %3057 = vrcp.f32 %v2008_v63  ;;  %v2519_v40 = vld [vmem:[%s4366_s7] ss:$0 sm:$0xff] }
 0xb6b   :  { %v2012_v41 = vpop.xlane.xlu1 %2011 }
 0xb6d   :  { %v3052_v57 = vpop.eup %3051 }
 0xb6e   :  { %v2050_v19 = vmul.f32 %v3052_v57, %v4153_v10 }
 0xb6f   :  { %v2014_v26 = vpop.xlane.xlu0 %2013 }
 0xb70   :  { %3059 = vrcp.f32 %v2014_v26 }
 0xb73   :  { %v2016_v36 = vpop.xlane.xlu1 %2015 }
 0xb75   :  { %v3054_v39 = vpop.eup %3053 }
 0xb76   :  { %v3056_v58 = vpop.eup %3055  ;;  %v2052_v17 = vmul.f32 %v3054_v39, %v4161_v20 }
 0xb77   :  { %v2018_v33 = vpop.xlane.xlu0 %2017  ;;  %v3058_v21 = vpop.eup %3057  ;;  %v2049_v54 = vmul.f32 %v3056_v58, %v4149_v0 }
 0xb78   :  { %3061 = vrcp.f32 %v2018_v33  ;;  %v2051_v60 = vmul.f32 %v3058_v21, %v4157_v28  ;;  %v4416_v21 = vld [vmem:[#allocation32_spill] sm:$0xff] }
 0xb79   :  { %3063 = vrcp.f32 %v2012_v41  ;;  %v2064_v12 = vpack.c.bf16 %v2050_v19, %v2049_v54  ;;  %v4417_v19 = vld [vmem:[#allocation28_spill] sm:$0xff] }
 0xb7a   :  { %3065 = vrcp.f32 %v2016_v36  ;;  %v2065_v6 = vpack.c.bf16 %v2052_v17, %v2051_v60  ;;  %v4419_v17 = vld [vmem:[#allocation30_spill] sm:$0xff]  ;;  %v4420_v60 = vld [vmem:[#allocation29_spill] sm:$0xff] }
 0xb7b   :  { %v2020_v3 = vpop.xlane.xlu1 %2019 }
 0xb7d   :  { %v3060_v27 = vpop.eup %3059 }
 0xb7e   :  { %v2054_v20 = vmul.f32 %v3060_v27, %v4169_v31 }
 0xb7f   :  { %v2022_v4 = vpop.xlane.xlu0 %2021 }
 0xb80   :  { %3067 = vrcp.f32 %v2022_v4 }
 0xb83   :  { %v2024_v55 = vpop.xlane.xlu1 %2023 }
 0xb85   :  { %v3062_v22 = vpop.eup %3061 }
 0xb86   :  { %v3064_v42 = vpop.eup %3063  ;;  %v2056_v30 = vmul.f32 %v3062_v22, %v4179_v14 }
 0xb87   :  { %v2026_v53 = vpop.xlane.xlu0 %2025  ;;  %v3066_v10 = vpop.eup %3065  ;;  %v2053_v0 = vmul.f32 %v3064_v42, %v4165_v7 }
 0xb88   :  { %3069 = vrcp.f32 %v2026_v53  ;;  %v2055_v8 = vmul.f32 %v3066_v10, %v4173_v18 }
 0xb89   :  { %3071 = vrcp.f32 %v2020_v3  ;;  %v2066_v28 = vpack.c.bf16 %v2054_v20, %v2053_v0 }
 0xb8a   :  { %3073 = vrcp.f32 %v2024_v55  ;;  %v2067_v37 = vpack.c.bf16 %v2056_v30, %v2055_v8 }
 0xb8b   :  { %v2028_v16 = vpop.xlane.xlu1 %2027  ;;  %v2030_v49 = vpop.xlane.xlu0 %2029 }
 0xb8c   :  { %3075 = vrcp.f32 %v2028_v16 }
 0xb8d   :  { %3077 = vrcp.f32 %v2030_v49  ;;  %v3068_v25 = vpop.eup %3067 }
 0xb8e   :  { %v2058_v47 = vmul.f32 %v3068_v25, %v4186_v23 }
 0xb8f   :  { %v2095_v2 = vpop.permute.xlu1 %2094  ;;  %v2262_v20 = vpop.permute.xlu0 %2261 }
 0xb90   :  { %2805 = vmatprep.subr.bf16.mxu1 %v2095_v2 }
 0xb91   :  { %2806 = vmatpush3.bf16.msra.mxu1 %v2095_v2  ;;  %v4418_v2 = vld [vmem:[#allocation31_spill] sm:$0xff] }
 0xb94   :  { %2808 = vmatmul.mubr.bf16.vlgmr.msra.gmra.mxu1 %v2064_v12 }
 0xb95   :  { %2811 = vmatprep.mubr.bf16.mxu1 %v2065_v6  ;;  %v3070_v44 = vpop.eup %3069  ;;  %v2260_v6 = vpop.permute.xlu1 %2259 }
 0xb96   :  { %v3072_v45 = vpop.eup %3071  ;;  %v2060_v56 = vmul.f32 %v3070_v44, %v4192_v29  ;;  %v4421_v44 = vld [vmem:[#allocation24_spill] sm:$0xff] }
 0xb97   :  { %v3074_v50 = vpop.eup %3073  ;;  %v2057_v31 = vmul.f32 %v3072_v45, %v4183_v59  ;;  %v2358_v45 = vsel %vm820_vm2, %v4421_v44, %v2262_v20 }
 0xb98   :  { %v2059_v14 = vmul.f32 %v3074_v50, %v4189_v15 }
 0xb99   :  { %v3076_v13 = vpop.eup %3075  ;;  %v2068_v7 = vpack.c.bf16 %v2058_v47, %v2057_v31  ;;  %v2258_v22 = vpop.permute.xlu1 %2257  ;;  %v4422_v31 = vld [vmem:[#allocation27_spill] sm:$0xff] }
 0xb9a   :  { %v3078_v24 = vpop.eup %3077  ;;  %v2069_v18 = vpack.c.bf16 %v2060_v56, %v2059_v14  ;;  %v2061_v11 = vmul.f32 %v3076_v13, %v4197_v51  ;;  %v2357_v14 = vsel %vm820_vm2, %v4422_v31, %v2260_v6  ;;  %v2393_v31 = vld [vmem:[%s4367_s8] sm:$0xff] }
 0xb9b   :  { %v2062_v52 = vmul.f32 %v3078_v24, %v4195_v61  ;;  %v3174_v61 = vmov 0.0  }
 0xb9c   :  { %2812 = vmatmul.mubr.bf16.gmra.mxu1 %v2066_v28  ;;  %2823 = vmatprep.subr.mxu0 %v3174_v61 }
 0xb9d   :  { %2815 = vmatprep.mubr.bf16.mxu1 %v2067_v37  ;;  %v2070_v46 = vpack.c.bf16 %v2062_v52, %v2061_v11  ;;  %2855 = vmatprep.mubr.msk.f32.mxu0 %vm3175_vm5, %v3174_v61  ;;  %v2256_v42 = vpop.permute.xlu1 %2255 }
 0xba1   :  { %v2254_v10 = vpop.permute.xlu1 %2253 }
 0xba4   :  { %2816 = vmatmul.mubr.bf16.gmra.mxu1 %v2068_v7 }
 0xba5   :  { %2819 = vmatprep.mubr.bf16.mxu1 %v2069_v18  ;;  %v2252_v30 = vpop.permute.xlu1 %2251 }
 0xba9   :  { %v2250_v8 = vpop.permute.xlu1 %2249 }
 0xbac   :  { %2820 = vmatmul.mubr.bf16.gmra.mxu1 %v2070_v46 }
 0xbad   :  { %v2248_v25 = vpop.permute.xlu1 %2247 }
 0xc54   :  { %v2809_v43 = vpop.f32.mrf.mxu1 }
 0xc55   :  { %v2161_v12 = vadd.f32 %v2809_v43, %v2519_v40  ;;  %v4423_v43 = vld [vmem:[#allocation26_spill] sm:$0xff] }
 0xc56   :  { %v2152_v23 = vpop.f32.mrf.mxu1 }
 0xc57   :  { %v2153_v49 = vadd.f32 %v2519_v40, %v2152_v23  ;;  %v2356_v23 = vsel %vm820_vm2, %v4423_v43, %v2258_v22  ;;  %v4433_v22 = vld [vmem:[#allocation12_spill] sm:$0xff] }
 0xc58   :  { %v2810_v9 = vpop.f32.mrf.mxu1 }
 0xc59   :  { %v2164_v54 = vadd.f32 %v2810_v9, %v2519_v40 }
 0xc5a   :  { %v2155_v29 = vpop.f32.mrf.mxu1 }
 0xc5b   :  { %v2156_v27 = vadd.f32 %v2519_v40, %v2155_v29 }
 0xc5c   :  { %v2813_v5 = vpop.f32.mrf.mxu1 }
 0xc5e   :  { %v2168_v59 = vpop.f32.mrf.mxu1 }
 0xc60   :  { %v2814_v48 = vpop.f32.mrf.mxu1 }
 0xc61   :  { %v2180_v39 = vadd.f32 %v2814_v48, %v2519_v40 }
 0xc62   :  { %v2171_v15 = vpop.f32.mrf.mxu1 }
 0xc64   :  { %v2817_v62 = vpop.f32.mrf.mxu1 }
 0xc65   :  { %v2193_v63 = vadd.f32 %v2817_v62, %v2519_v40 }
 0xc66   :  { %v2184_v32 = vpop.f32.mrf.mxu1 }
 0xc67   :  { %2315 = vrot.lane.b32.xlu0 %v2193_v63, %s3166_s12  ;;  %v2185_v41 = vadd.f32 %v2519_v40, %v2184_v32 }
 0xc68   :  { %v2818_v51 = vpop.f32.mrf.mxu1 }
 0xc69   :  { %v2196_v26 = vadd.f32 %v2818_v51, %v2519_v40  ;;  %v4426_v51 = vld [vmem:[#allocation23_spill] sm:$0xff] }
 0xc6a   :  { %v2187_v1 = vpop.f32.mrf.mxu1 }
 0xc6b   :  { %2311 = vrot.lane.b32.xlu0 %v2185_v41, %s3166_s12  ;;  %v2188_v55 = vadd.f32 %v2519_v40, %v2187_v1  ;;  %v2353_v41 = vsel %vm820_vm2, %v4426_v51, %v2252_v30  ;;  %v4434_v30 = vld [vmem:[#allocation15_spill] sm:$0xff] }
 0xc6c   :  { %v2821_v36 = vpop.f32.mrf.mxu1 }
 0xc6d   :  { %v2209_v57 = vadd.f32 %v2821_v36, %v2519_v40 }
 0xc6e   :  { %v2200_v3 = vpop.f32.mrf.mxu1 }
 0xc6f   :  { %2317 = vrot.lane.b32.xlu0 %v2196_v26, %s3166_s12  ;;  %v2201_v16 = vadd.f32 %v2519_v40, %v2200_v3  ;;  %v4427_v26 = vld [vmem:[#allocation22_spill] sm:$0xff] }
 0xc70   :  { %v2822_v33 = vpop.f32.mrf.mxu1  ;;  %v2352_v3 = vsel %vm820_vm2, %v4427_v26, %v2250_v8 }
 0xc71   :  { %v2212_v4 = vadd.f32 %v2822_v33, %v2519_v40 }
 0xc72   :  { %v2203_v53 = vpop.f32.mrf.mxu1 }
 0xc73   :  { %2313 = vrot.lane.b32.xlu0 %v2188_v55, %s3166_s12  ;;  %2325 = vrot.lane.b32.xlu1 %v2212_v4, %s3166_s12  ;;  %v2204_v58 = vadd.f32 %v2519_v40, %v2203_v53  ;;  %v4428_v4 = vld [vmem:[#allocation21_spill] sm:$0xff] }
 0xc77   :  { %2323 = vrot.lane.b32.xlu0 %v2209_v57, %s3166_s12  ;;  %2245 = vrot.lane.b32.xlu1 %v3865_v35, %s3173_s6  ;;  %v2177_v35 = vadd.f32 %v2813_v5, %v2519_v40  ;;  %v2351_v57 = vsel %vm820_vm2, %v4428_v4, %v2248_v25 }
 0xc7b   :  { %2243 = vrot.lane.b32.xlu1 %v3871_v38, %s3173_s6  ;;  %2319 = vrot.lane.b32.xlu0 %v2201_v16, %s3166_s12  ;;  %v2172_v38 = vadd.f32 %v2519_v40, %v2171_v15 }
 0xc7f   :  { %2241 = vrot.lane.b32.xlu1 %v3869_v34, %s3173_s6  ;;  %2309 = vrot.lane.b32.xlu0 %v2180_v39, %s3166_s12  ;;  %v2169_v34 = vadd.f32 %v2519_v40, %v2168_v59  ;;  %v4424_v59 = vld [vmem:[#allocation25_spill] sm:$0xff]  ;;  %v4425_v40 = vld [vmem:[#allocation20_spill] sm:$0xff] }
 0xc80   :  { %v2355_v48 = vsel %vm820_vm2, %v4424_v59, %v2256_v42  ;;  %v2354_v62 = vsel %vm820_vm2, %v4425_v40, %v2254_v10  ;;  %v4429_v39 = vld [vmem:[#allocation16_spill] sm:$0xff] }
 0xc83   :  { %2239 = vrot.lane.b32.xlu1 %v4416_v21, %s3173_s6  ;;  %2321 = vrot.lane.b32.xlu0 %v2204_v58, %s3166_s12 }
 0xc87   :  { %2237 = vrot.lane.b32.xlu1 %v4417_v19, %s3173_s6  ;;  %2307 = vrot.lane.b32.xlu0 %v2177_v35, %s3166_s12  ;;  %v4430_v19 = vld [vmem:[#allocation19_spill] sm:$0xff] }
 0xc8b   :  { %2235 = vrot.lane.b32.xlu1 %v4418_v2, %s3173_s6  ;;  %2305 = vrot.lane.b32.xlu0 %v2172_v38, %s3166_s12 }
 0xc8f   :  { %2233 = vrot.lane.b32.xlu1 %v4419_v17, %s3173_s6  ;;  %2303 = vrot.lane.b32.xlu0 %v2169_v34, %s3166_s12  ;;  %v4431_v34 = vld [vmem:[#allocation18_spill] sm:$0xff] }
 0xc93   :  { %2231 = vrot.lane.b32.xlu1 %v4420_v60, %s3173_s6  ;;  %2301 = vrot.lane.b32.xlu0 %v2164_v54, %s3166_s12 }
 0xc97   :  { %2299 = vrot.lane.b32.xlu0 %v2161_v12, %s3166_s12  ;;  %v4432_v12 = vld [vmem:[#allocation17_spill] sm:$0xff] }
 0xc9b   :  { %2297 = vrot.lane.b32.xlu0 %v2156_v27, %s3166_s12 }
 0xc9f   :  { %2295 = vrot.lane.b32.xlu0 %v2153_v49, %s3166_s12 }
 0xcd9   :  { %v2316_v0 = vpop.permute.xlu0 %2315 }
 0xcda   :  { %v2370_v1 = vsel %vm2359_vm7, %v2353_v41, %v2316_v0 }
 0xcdd   :  { %v2312_v28 = vpop.permute.xlu0 %2311 }
 0xcde   :  { %v2368_v16 = vsel %vm2359_vm7, %v2351_v57, %v2312_v28  ;;  %v4435_v28 = vld [vmem:[#allocation14_spill] sm:$0xff] }
 0xce1   :  { %v2318_v37 = vpop.permute.xlu0 %2317 }
 0xce2   :  { %v2371_v32 = vsel %vm2359_vm7, %v2354_v62, %v2318_v37 }
 0xce5   :  { %v2326_v50 = vpop.permute.xlu1 %2325  ;;  %v2314_v47 = vpop.permute.xlu0 %2313 }
 0xce6   :  { %v2375_v56 = vsel %vm2359_vm7, %v2358_v45, %v2326_v50  ;;  %v2369_v55 = vsel %vm2359_vm7, %v2352_v3, %v2314_v47  ;;  %v4436_v50 = vld [vmem:[#allocation13_spill] sm:$0xff] }
 0xce7   :  { %2824 = vmatpush3.msk.msra.mxu0 %vm2376_vm6, %v2375_v56 }
 0xce8   :  { %2825 = vmatprep.subr.mxu0 %v3174_v61 }
 0xce9   :  { %v2246_v13 = vpop.permute.xlu1 %2245  ;;  %v2324_v7 = vpop.permute.xlu0 %2323 }
 0xcea   :  { %v2374_v24 = vsel %vm2359_vm7, %v2357_v14, %v2324_v7  ;;  %v2350_v53 = vsel %vm820_vm2, %v4429_v39, %v2246_v13 }
 0xceb   :  { %2826 = vmatpush3.msk.msra.mxu0 %vm2376_vm6, %v2374_v24 }
 0xcec   :  { %2827 = vmatprep.subr.mxu0 %v3174_v61 }
 0xced   :  { %v2244_v18 = vpop.permute.xlu1 %2243  ;;  %v2320_v11 = vpop.permute.xlu0 %2319 }
 0xcee   :  { %v2372_v15 = vsel %vm2359_vm7, %v2355_v48, %v2320_v11  ;;  %v2349_v38 = vsel %vm820_vm2, %v4430_v19, %v2244_v18 }
 0xcf1   :  { %v2242_v52 = vpop.permute.xlu1 %2241  ;;  %v2310_v46 = vpop.permute.xlu0 %2309 }
 0xcf2   :  { %v2367_v21 = vsel %vm2359_vm7, %v2350_v53, %v2310_v46  ;;  %v2348_v17 = vsel %vm820_vm2, %v4431_v34, %v2242_v52 }
 0xcf5   :  { %v2322_v9 = vpop.permute.xlu0 %2321  ;;  %v2240_v29 = vpop.permute.xlu1 %2239 }
 0xcf6   :  { %v2373_v5 = vsel %vm2359_vm7, %v2356_v23, %v2322_v9  ;;  %v2347_v27 = vsel %vm820_vm2, %v4432_v12, %v2240_v29 }
 0xcf7   :  { %2828 = vmatpush3.msk.msra.mxu0 %vm2376_vm6, %v2373_v5 }
 0xcf8   :  { %2829 = vmatprep.subr.mxu0 %v3174_v61 }
 0xcf9   :  { %2830 = vmatpush3.msk.msra.mxu0 %vm2376_vm6, %v2372_v15  ;;  %v2308_v63 = vpop.permute.xlu0 %2307  ;;  %v2238_v36 = vpop.permute.xlu1 %2237 }
 0xcfa   :  { %2831 = vmatprep.subr.mxu0 %v3174_v61  ;;  %v2366_v2 = vsel %vm2359_vm7, %v2349_v38, %v2308_v63  ;;  %v2346_v42 = vsel %vm820_vm2, %v4433_v22, %v2238_v36 }
 0xcfb   :  { %2832 = vmatpush3.msk.msra.mxu0 %vm2376_vm6, %v2371_v32 }
 0xcfc   :  { %2833 = vmatprep.subr.mxu0 %v3174_v61 }
 0xcfd   :  { %2834 = vmatpush3.msk.msra.mxu0 %vm2376_vm6, %v2370_v1  ;;  %v2306_v33 = vpop.permute.xlu0 %2305  ;;  %v2236_v35 = vpop.permute.xlu1 %2235 }
 0xcfe   :  { %2835 = vmatprep.subr.mxu0 %v3174_v61  ;;  %v2365_v60 = vsel %vm2359_vm7, %v2348_v17, %v2306_v33  ;;  %v2345_v0 = vsel %vm820_vm2, %v4434_v30, %v2236_v35 }
 0xcff   :  { %2836 = vmatpush3.msk.msra.mxu0 %vm2376_vm6, %v2369_v55 }
 0xd00   :  { %2837 = vmatprep.subr.mxu0 %v3174_v61 }
 0xd01   :  { %2838 = vmatpush3.msk.msra.mxu0 %vm2376_vm6, %v2368_v16  ;;  %v2304_v58 = vpop.permute.xlu0 %2303  ;;  %v2234_v49 = vpop.permute.xlu1 %2233 }
 0xd02   :  { %2839 = vmatprep.subr.mxu0 %v3174_v61  ;;  %v2364_v6 = vsel %vm2359_vm7, %v2347_v27, %v2304_v58  ;;  %v2344_v25 = vsel %vm820_vm2, %v4435_v28, %v2234_v49 }
 0xd03   :  { %2840 = vmatpush3.msk.msra.mxu0 %vm2376_vm6, %v2367_v21 }
 0xd04   :  { %2841 = vmatprep.subr.mxu0 %v3174_v61 }
 0xd05   :  { %2842 = vmatpush3.msk.msra.mxu0 %vm2376_vm6, %v2366_v2  ;;  %v2302_v54 = vpop.permute.xlu0 %2301  ;;  %v2232_v44 = vpop.permute.xlu1 %2231 }
 0xd06   :  { %2843 = vmatprep.subr.mxu0 %v3174_v61  ;;  %v2363_v20 = vsel %vm2359_vm7, %v2346_v42, %v2302_v54  ;;  %v2343_v47 = vsel %vm820_vm2, %v4436_v50, %v2232_v44 }
 0xd07   :  { %2844 = vmatpush3.msk.msra.mxu0 %vm2376_vm6, %v2365_v60 }
 0xd08   :  { %2845 = vmatprep.subr.mxu0 %v3174_v61 }
 0xd09   :  { %2846 = vmatpush3.msk.msra.mxu0 %vm2376_vm6, %v2364_v6  ;;  %v2300_v10 = vpop.permute.xlu0 %2299 }
 0xd0a   :  { %2847 = vmatprep.subr.mxu0 %v3174_v61  ;;  %v2362_v8 = vsel %vm2359_vm7, %v2345_v0, %v2300_v10 }
 0xd0b   :  { %2848 = vmatpush3.msk.msra.mxu0 %vm2376_vm6, %v2363_v20 }
 0xd0c   :  { %2849 = vmatprep.subr.mxu0 %v3174_v61 }
 0xd0d   :  { %2850 = vmatpush3.msk.msra.mxu0 %vm2376_vm6, %v2362_v8  ;;  %v2298_v37 = vpop.permute.xlu0 %2297 }
 0xd0e   :  { %v2361_v45 = vsel %vm2359_vm7, %v2344_v25, %v2298_v37  ;;  %2851 = vmatprep.subr.mxu0 %v3174_v61 }
 0xd0f   :  { %2852 = vmatpush3.msk.msra.mxu0 %vm2376_vm6, %v2361_v45 }
 0xd10   :  { %2853 = vmatprep.subr.mxu0 %v3174_v61 }
 0xd11   :  { %v2296_v56 = vpop.permute.xlu0 %2295 }
 0xd12   :  { %v2360_v14 = vsel %vm2359_vm7, %v2343_v47, %v2296_v56 }
 0xd13   :  { %2854 = vmatpush3.msk.msra.mxu0 %vm2376_vm6, %v2360_v14 }
 0xd14   :  { %2856 = vmatmul.mubr.f32.vlgmr.msra.gmra.mxu0 %v2393_v31 }
 0xdd4   :  { %v2460_v13 = vpop.f32.mrf.mxu0 }
 0xdd5   :  { %2464 = vst [vmem:[#allocation8] sm:$0xff] %v2460_v13 }
 0xdd6   :  { %v2857_v7 = vpop.f32.mrf.mxu0 }
 0xdd7   :  { %3150 = shalt.err (!%p3147_p5)
}
 0xdd8   :  { %2474 = dma.vmem_to_hbm [thread:$0]  %s2472_s17, 128, %s4368_s9, [#allocation4]  }
 0xdd9   :  { %3163 = dma.done.wait [#allocation4], 128  }
 0xdda   :  { %3164 = vsyncadd [#allocation4], 4294967168 }
 0xddb   :  { %2478 = vsyncpa [#allocation3], 1 }
 0xddc   :  { %2479 = vsyncpa [#allocation6], 1 }
 0xddd   :  { %2480 = vsyncpa [#allocation4], 1 }

</bundles_post_ra>
